<compile_context>
chip_gen: v6e
topology: v6e:2x2x1
jax: 0.10.0
libtpu: 0.0.40
codegen_flags: <defaults>
</compile_context>

<pallas_src>
import functools

import jax
import jax.numpy as jnp
from jax.experimental import pallas as pl
from jax.experimental.pallas import tpu as pltpu

# Hyperparameters from CNN_Text.__init__ (vocab/embed sizes scaled down for test)
FILTER_SIZES = (1, 2, 3, 5)
NUM_FILTERS = 36
N_CLASSES = 14

NSLOT = 128                                  # one 128-lane slot per (K, shift k) weight slice
TOTAL_SLOTS = sum(FILTER_SIZES)              # 11
CPAD = TOTAL_SLOTS * NSLOT                   # 1408 packed conv-weight columns
ACT_W = len(FILTER_SIZES) * NSLOT            # 512-lane pooled activation (one slot per filter size)
NPAD = 128                                   # lane-dense logits / fc / bias width

# Starting slot (in units of NSLOT lanes) of each filter-size block.
_SB, _o = [], 0
for _K in FILTER_SIZES:
    _SB.append(_o)
    _o += _K
SLOT_BASE = tuple(_SB)                       # (0, 1, 3, 6)


def _round_up(x, m):
    return (x + m - 1) // m * m


def _pick_batch_tile(batch):
    """Batch tile (sublane-aligned) and padded batch."""
    b8 = _round_up(batch, 8)
    if b8 >= 512:
        tb = 256                             # big tiles: amortize grid-step overhead (v6e/v7x)
    elif b8 >= 128:
        tb = _round_up(b8, 16) // 2          # >=2 grid steps so both v7x cores get work
    else:
        tb = b8                              # single small tile
    return tb, _round_up(b8, tb)


def cnn_text_kernel(emb_ref, w_ref, cb_ref, fcw_ref, fcb_ref, out_ref, *, seq_len):
    TB, Lp, E = emb_ref.shape
    F = NUM_FILTERS

    # Layout-preserving reshape (Lp is a multiple of 16 = bf16 sublane tile).
    emb2d = emb_ref[...].reshape(TB * Lp, E)                       # bf16 (TB*Lp, E)

    pooled_slots = []
    for i, K in enumerate(FILTER_SIZES):
        base = SLOT_BASE[i] * NSLOT
        ncol = K * NSLOT
        # One MXU pass per filter-size block (bf16 in, f32 accumulate).
        # Column slot k (lanes [k*128, k*128+36)) holds emb[b,t] . w_K[:,k,:].
        y = jnp.dot(emb2d, w_ref[:, base:base + ncol],
                    preferred_element_type=jnp.float32)            # (TB*Lp, K*128) f32
        y = y.reshape(TB, Lp, ncol)                                 # layout-preserving
        T = seq_len - K + 1                                         # valid conv positions (real L)
        conv = y[:, 0:T, 0:NSLOT]
        for k in range(1, K):
            # Full 128-lane-aligned slot; only a small sublane offset k remains.
            conv = conv + y[:, k:k + T, k * NSLOT:(k + 1) * NSLOT]
        pooled_slots.append(jnp.max(conv, axis=1))                  # (TB, 128); lanes >= 36 are exact zeros

    # Lane-aligned concat -> (TB, 512); bias + ReLU after pool (equivalent to
    # max_t(relu(conv + b)) since ReLU is monotone and bias is constant over t).
    act = jnp.concatenate(pooled_slots, axis=-1)
    act = jnp.maximum(act + cb_ref[...], 0.0)

    # dropout(p=0.1): identity at inference time.
    # TODO(synk): training-mode dropout (random mask + 1/(1-p) scale) not implemented.

    # Single fused bf16 fc matmul; zero weight rows null out the unused lanes.
    logits = jnp.dot(act.astype(jnp.bfloat16), fcw_ref[...],
                     preferred_element_type=jnp.float32)            # (TB, 128) f32
    out_ref[...] = logits + fcb_ref[...]


def cnn_text_forward(token_ids, params):
    F = NUM_FILTERS

    # --- glue (bf16 embedding gather + weight packing), plain JAX ---
    emb_tbl = params['embedding'].astype(jnp.bfloat16)              # cast table once, gather in bf16
    emb = jnp.take(emb_tbl, token_ids, axis=0)                      # (B, L, E) bf16
    B, L, E = emb.shape
    assert L >= max(FILTER_SIZES), "sequence shorter than the largest conv filter"

    E_pad = _round_up(E, 128)
    L_pad = _round_up(L, 16)                                        # bf16 sublane tile
    TB, B_pad = _pick_batch_tile(B)
    emb = jnp.pad(emb, ((0, B_pad - B), (0, L_pad - L), (0, E_pad - E)))

    # Packed conv weight (E_pad, 1408) bf16: slot (SLOT_BASE[i] + k) holds
    # w_K[:, k, :].T in lanes [slot*128, slot*128 + 36); other lanes are zero.
    wpacked = jnp.zeros((E_pad, CPAD), jnp.float32)
    for i, K in enumerate(FILTER_SIZES):
        w = params[f'conv_w{K}']                                    # (F, K, E)
        for k in range(K):
            s = (SLOT_BASE[i] + k) * NSLOT
            wpacked = wpacked.at[:E, s:s + F].set(w[:, k, :].T)
    wpacked = wpacked.astype(jnp.bfloat16)

    # Lane-dense conv bias (1, 512): filter-size block i lives at lanes [i*128, i*128+36).
    cb = jnp.zeros((1, ACT_W), jnp.float32)
    for i, K in enumerate(FILTER_SIZES):
        cb = cb.at[0, i * NSLOT:i * NSLOT + F].set(params[f'conv_b{K}'])

    # Fused fc weight (512, 128) bf16 at the same 128-lane block positions; unused rows zero.
    fcw = jnp.zeros((ACT_W, NPAD), jnp.float32)
    for i in range(len(FILTER_SIZES)):
        fcw = fcw.at[i * NSLOT:i * NSLOT + F, :N_CLASSES].set(
            params['fc_w'][:, i * F:(i + 1) * F].T)
    fcw = fcw.astype(jnp.bfloat16)
    fcb = jnp.zeros((1, NPAD), jnp.float32).at[0, :N_CLASSES].set(params['fc_b'])

    grid = (B_pad // TB,)
    cost = pl.CostEstimate(
        flops=2 * B_pad * L_pad * E_pad * CPAD + 2 * B_pad * ACT_W * NPAD,
        transcendentals=0,
        bytes_accessed=(emb.size * 2 + wpacked.size * 2 + fcw.size * 2
                        + (cb.size + fcb.size + B_pad * NPAD) * 4))

    kernel = functools.partial(cnn_text_kernel, seq_len=L)
    out = pl.pallas_call(
        kernel,
        out_shape=jax.ShapeDtypeStruct((B_pad, NPAD), jnp.float32),
        grid_spec=pltpu.PrefetchScalarGridSpec(
            num_scalar_prefetch=0,
            grid=grid,
            in_specs=[
                pl.BlockSpec((TB, L_pad, E_pad), lambda b: (b, 0, 0)),  # emb batch tile
                pl.BlockSpec((E_pad, CPAD), lambda b: (0, 0)),          # packed conv weight
                pl.BlockSpec((1, ACT_W), lambda b: (0, 0)),             # lane-dense conv bias
                pl.BlockSpec((ACT_W, NPAD), lambda b: (0, 0)),          # fused fc weight
                pl.BlockSpec((1, NPAD), lambda b: (0, 0)),              # padded fc bias
            ],
            out_specs=pl.BlockSpec((TB, NPAD), lambda b: (b, 0)),
        ),
        compiler_params=pltpu.CompilerParams(
            dimension_semantics=("parallel",),
            vmem_limit_bytes=48 * 1024 * 1024),                         # headroom above 32 MiB default;
        cost_estimate=cost,                                             # still < v7x 64 MiB physical
    )(emb, wpacked, cb, fcw, fcb)
    return out[:B, :N_CLASSES]


def reference_forward(token_ids, params):
    # Pure-JAX f32 reference reproducing the PyTorch forward semantics.
    emb = jnp.take(params['embedding'], token_ids, axis=0).astype(jnp.float32)
    B, L, _ = emb.shape
    feats = []
    for K in FILTER_SIZES:
        w = params[f'conv_w{K}']
        b = params[f'conv_b{K}']
        T = L - K + 1
        conv = jnp.zeros((B, T, NUM_FILTERS), jnp.float32)
        for k in range(K):
            conv = conv + jnp.einsum('bte,fe->btf', emb[:, k:k + T, :], w[:, k, :])
        conv = jax.nn.relu(conv + b[None, None, :])
        feats.append(jnp.max(conv, axis=1))
    feats = jnp.concatenate(feats, axis=1)
    return feats @ params['fc_w'].T + params['fc_b']


if __name__ == "__main__":
    # Small test shapes consistent with the module's forward:
    #   token ids x: (batch=4, seq_len=16), vocab=1000, embed=128
    B, L, E, V = 4, 16, 128, 1000

    key = jax.random.PRNGKey(0)
    keys = jax.random.split(key, 12)
    params = {}
    params['embedding'] = jax.random.normal(keys[0], (V, E), jnp.float32)
    for i, K in enumerate(FILTER_SIZES):
        params[f'conv_w{K}'] = (
            jax.random.normal(keys[1 + i], (NUM_FILTERS, K, E), jnp.float32) * 0.05)
        params[f'conv_b{K}'] = (
            jax.random.normal(keys[5 + i], (NUM_FILTERS,), jnp.float32) * 0.05)
    params['fc_w'] = (
        jax.random.normal(keys[9], (N_CLASSES, len(FILTER_SIZES) * NUM_FILTERS),
                          jnp.float32) * 0.05)
    params['fc_b'] = jax.random.normal(keys[10], (N_CLASSES,), jnp.float32) * 0.05

    token_ids = jax.random.randint(keys[11], (B, L), 0, V, dtype=jnp.int32)

    logits = jax.block_until_ready(cnn_text_forward(token_ids, params))
    ref = jax.block_until_ready(reference_forward(token_ids, params))

    assert logits.shape == (B, N_CLASSES)
    # bf16 MXU inputs (conv + fc) vs f32 reference -> loosened tolerance.
    assert jnp.allclose(logits, ref, rtol=2e-2, atol=2e-2), (
        f"max abs err {jnp.max(jnp.abs(logits - ref))}")
    print("KERNEL_OK")
</pallas_src>

<mosaic_0001>
module attributes {stable_mosaic.version = 11 : i64} {
  func.func @cnn_text_kernel(%arg0: i32, %arg1: memref<8x16x128xbf16, #tpu.memory_space<vmem>>, %arg2: memref<128x1408xbf16, #tpu.memory_space<vmem>>, %arg3: memref<1x512xf32, #tpu.memory_space<vmem>>, %arg4: memref<512x128xbf16, #tpu.memory_space<vmem>>, %arg5: memref<1x128xf32, #tpu.memory_space<vmem>>, %arg6: memref<8x128xf32, #tpu.memory_space<vmem>>) attributes {dimension_semantics = [#tpu.dimension_semantics<parallel>], iteration_bounds = array<i64: 1>, scalar_prefetch = 0 : i64, scratch_operands = 0 : i64, tpu.core_type = #tpu.core_type<tc>, window_params = [{transform_indices = @transform_0, window_bounds = array<i64: 8, 16, 128>}, {pipeline_mode = #tpu.pipeline_mode<synchronous>, transform_indices = @transform_1, window_bounds = array<i64: 128, 1408>}, {pipeline_mode = #tpu.pipeline_mode<synchronous>, transform_indices = @transform_2, window_bounds = array<i64: 1, 512>}, {pipeline_mode = #tpu.pipeline_mode<synchronous>, transform_indices = @transform_3, window_bounds = array<i64: 512, 128>}, {pipeline_mode = #tpu.pipeline_mode<synchronous>, transform_indices = @transform_4, window_bounds = array<i64: 1, 128>}, {transform_indices = @transform_5, window_bounds = array<i64: 8, 128>}]} {
    %c0 = arith.constant 0 : index
    %c0_0 = arith.constant 0 : index
    %c0_1 = arith.constant 0 : index
    %0 = vector.load %arg1[%c0, %c0_0, %c0_1] : memref<8x16x128xbf16, #tpu.memory_space<vmem>>, vector<8x16x128xbf16>
    %1 = vector.shape_cast %0 : vector<8x16x128xbf16> to vector<128x128xbf16>
    %c0_2 = arith.constant 0 : index
    %c0_3 = arith.constant 0 : index
    %2 = vector.load %arg2[%c0_2, %c0_3] : memref<128x1408xbf16, #tpu.memory_space<vmem>>, vector<128x128xbf16>
    %cst = arith.constant dense<0.000000e+00> : vector<128x128xf32>
    %3 = tpu.matmul %1, %2, %cst {dimension_numbers = #tpu.dot_dimension_numbers<[1], [0], [0], [1], [0, 0, 1, 1], [], []>} : vector<128x128xbf16>, vector<128x128xbf16>, vector<128x128xf32> -> vector<128x128xf32>
    %4 = vector.shape_cast %3 : vector<128x128xf32> to vector<8x16x128xf32>
    %cst_4 = arith.constant dense<0xFF800000> : vector<8x128xf32>
    %5 = vector.multi_reduction <maximumf>, %4, %cst_4 [1] : vector<8x16x128xf32> to vector<8x128xf32>
    %c0_5 = arith.constant 0 : index
    %c128 = arith.constant 128 : index
    %6 = vector.load %arg2[%c0_5, %c128] : memref<128x1408xbf16, #tpu.memory_space<vmem>>, vector<128x256xbf16>
    %cst_6 = arith.constant dense<0.000000e+00> : vector<128x256xf32>
    %7 = tpu.matmul %1, %6, %cst_6 {dimension_numbers = #tpu.dot_dimension_numbers<[1], [0], [0], [1], [0, 0, 1, 1], [], []>} : vector<128x128xbf16>, vector<128x256xbf16>, vector<128x256xf32> -> vector<128x256xf32>
    %8 = vector.shape_cast %7 : vector<128x256xf32> to vector<8x16x256xf32>
    %9 = vector.extract_strided_slice %8 {offsets = [0, 0, 0], sizes = [8, 15, 128], strides = [1, 1, 1]} : vector<8x16x256xf32> to vector<8x15x128xf32>
    %10 = vector.extract_strided_slice %8 {offsets = [0, 1, 128], sizes = [8, 15, 128], strides = [1, 1, 1]} : vector<8x16x256xf32> to vector<8x15x128xf32>
    %11 = arith.addf %9, %10 : vector<8x15x128xf32>
    %cst_7 = arith.constant dense<0xFF800000> : vector<8x128xf32>
    %12 = vector.multi_reduction <maximumf>, %11, %cst_7 [1] : vector<8x15x128xf32> to vector<8x128xf32>
    %c0_8 = arith.constant 0 : index
    %c384 = arith.constant 384 : index
    %13 = vector.load %arg2[%c0_8, %c384] : memref<128x1408xbf16, #tpu.memory_space<vmem>>, vector<128x384xbf16>
    %cst_9 = arith.constant dense<0.000000e+00> : vector<128x384xf32>
    %14 = tpu.matmul %1, %13, %cst_9 {dimension_numbers = #tpu.dot_dimension_numbers<[1], [0], [0], [1], [0, 0, 1, 1], [], []>} : vector<128x128xbf16>, vector<128x384xbf16>, vector<128x384xf32> -> vector<128x384xf32>
    %15 = vector.shape_cast %14 : vector<128x384xf32> to vector<8x16x384xf32>
    %16 = vector.extract_strided_slice %15 {offsets = [0, 0, 0], sizes = [8, 14, 128], strides = [1, 1, 1]} : vector<8x16x384xf32> to vector<8x14x128xf32>
    %17 = vector.extract_strided_slice %15 {offsets = [0, 1, 128], sizes = [8, 14, 128], strides = [1, 1, 1]} : vector<8x16x384xf32> to vector<8x14x128xf32>
    %18 = arith.addf %16, %17 : vector<8x14x128xf32>
    %19 = vector.extract_strided_slice %15 {offsets = [0, 2, 256], sizes = [8, 14, 128], strides = [1, 1, 1]} : vector<8x16x384xf32> to vector<8x14x128xf32>
    %20 = arith.addf %18, %19 : vector<8x14x128xf32>
    %cst_10 = arith.constant dense<0xFF800000> : vector<8x128xf32>
    %21 = vector.multi_reduction <maximumf>, %20, %cst_10 [1] : vector<8x14x128xf32> to vector<8x128xf32>
    %c0_11 = arith.constant 0 : index
    %c768 = arith.constant 768 : index
    %22 = vector.load %arg2[%c0_11, %c768] : memref<128x1408xbf16, #tpu.memory_space<vmem>>, vector<128x640xbf16>
    %cst_12 = arith.constant dense<0.000000e+00> : vector<128x640xf32>
    %23 = tpu.matmul %1, %22, %cst_12 {dimension_numbers = #tpu.dot_dimension_numbers<[1], [0], [0], [1], [0, 0, 1, 1], [], []>} : vector<128x128xbf16>, vector<128x640xbf16>, vector<128x640xf32> -> vector<128x640xf32>
    %24 = vector.shape_cast %23 : vector<128x640xf32> to vector<8x16x640xf32>
    %25 = vector.extract_strided_slice %24 {offsets = [0, 0, 0], sizes = [8, 12, 128], strides = [1, 1, 1]} : vector<8x16x640xf32> to vector<8x12x128xf32>
    %26 = vector.extract_strided_slice %24 {offsets = [0, 1, 128], sizes = [8, 12, 128], strides = [1, 1, 1]} : vector<8x16x640xf32> to vector<8x12x128xf32>
    %27 = arith.addf %25, %26 : vector<8x12x128xf32>
    %28 = vector.extract_strided_slice %24 {offsets = [0, 2, 256], sizes = [8, 12, 128], strides = [1, 1, 1]} : vector<8x16x640xf32> to vector<8x12x128xf32>
    %29 = arith.addf %27, %28 : vector<8x12x128xf32>
    %30 = vector.extract_strided_slice %24 {offsets = [0, 3, 384], sizes = [8, 12, 128], strides = [1, 1, 1]} : vector<8x16x640xf32> to vector<8x12x128xf32>
    %31 = arith.addf %29, %30 : vector<8x12x128xf32>
    %32 = vector.extract_strided_slice %24 {offsets = [0, 4, 512], sizes = [8, 12, 128], strides = [1, 1, 1]} : vector<8x16x640xf32> to vector<8x12x128xf32>
    %33 = arith.addf %31, %32 : vector<8x12x128xf32>
    %cst_13 = arith.constant dense<0xFF800000> : vector<8x128xf32>
    %34 = vector.multi_reduction <maximumf>, %33, %cst_13 [1] : vector<8x12x128xf32> to vector<8x128xf32>
    %35 = tpu.concatenate %5, %12, %21, %34 in 1 : vector<8x128xf32>, vector<8x128xf32>, vector<8x128xf32>, vector<8x128xf32> -> vector<8x512xf32>
    %c0_14 = arith.constant 0 : index
    %c0_15 = arith.constant 0 : index
    %36 = vector.load %arg3[%c0_14, %c0_15] : memref<1x512xf32, #tpu.memory_space<vmem>>, vector<1x512xf32>
    %37 = vector.broadcast %36 : vector<1x512xf32> to vector<8x512xf32>
    %38 = arith.addf %35, %37 : vector<8x512xf32>
    %cst_16 = arith.constant 0.000000e+00 : f32
    %39 = vector.broadcast %cst_16 : f32 to vector<8x512xf32>
    %40 = arith.maximumf %38, %39 : vector<8x512xf32>
    %41 = arith.truncf %40 : vector<8x512xf32> to vector<8x512xbf16>
    %c0_17 = arith.constant 0 : index
    %c0_18 = arith.constant 0 : index
    %42 = vector.load %arg4[%c0_17, %c0_18] : memref<512x128xbf16, #tpu.memory_space<vmem>>, vector<512x128xbf16>
    %cst_19 = arith.constant dense<0.000000e+00> : vector<8x128xf32>
    %43 = tpu.matmul %41, %42, %cst_19 {dimension_numbers = #tpu.dot_dimension_numbers<[1], [0], [0], [1], [0, 0, 1, 1], [], []>} : vector<8x512xbf16>, vector<512x128xbf16>, vector<8x128xf32> -> vector<8x128xf32>
    %c0_20 = arith.constant 0 : index
    %c0_21 = arith.constant 0 : index
    %44 = vector.load %arg5[%c0_20, %c0_21] : memref<1x128xf32, #tpu.memory_space<vmem>>, vector<1x128xf32>
    %45 = vector.broadcast %44 : vector<1x128xf32> to vector<8x128xf32>
    %46 = arith.addf %43, %45 : vector<8x128xf32>
    %c0_22 = arith.constant 0 : index
    %c0_23 = arith.constant 0 : index
    %47 = vector.load %arg6[%c0_22, %c0_23] : memref<8x128xf32, #tpu.memory_space<vmem>>, vector<8x128xf32>
    tpu.vector_store %arg6[%c0_22, %c0_23], %46 {strides = array<i32>} : memref<8x128xf32, #tpu.memory_space<vmem>>, vector<8x128xf32>,
    return
  }
  func.func @transform_0(%arg0: i32) -> (i32, i32, i32) {
    %c0_i32 = arith.constant 0 : i32
    %c0_i32_0 = arith.constant 0 : i32
    %c0_i32_1 = arith.constant 0 : i32
    return %arg0, %c0_i32, %c0_i32_0 : i32, i32, i32
  }
  func.func @transform_1(%arg0: i32) -> (i32, i32) {
    %c0_i32 = arith.constant 0 : i32
    %c0_i32_0 = arith.constant 0 : i32
    %c0_i32_1 = arith.constant 0 : i32
    return %c0_i32, %c0_i32_0 : i32, i32
  }
  func.func @transform_2(%arg0: i32) -> (i32, i32) {
    %c0_i32 = arith.constant 0 : i32
    %c0_i32_0 = arith.constant 0 : i32
    %c0_i32_1 = arith.constant 0 : i32
    return %c0_i32, %c0_i32_0 : i32, i32
  }
  func.func @transform_3(%arg0: i32) -> (i32, i32) {
    %c0_i32 = arith.constant 0 : i32
    %c0_i32_0 = arith.constant 0 : i32
    %c0_i32_1 = arith.constant 0 : i32
    return %c0_i32, %c0_i32_0 : i32, i32
  }
  func.func @transform_4(%arg0: i32) -> (i32, i32) {
    %c0_i32 = arith.constant 0 : i32
    %c0_i32_0 = arith.constant 0 : i32
    %c0_i32_1 = arith.constant 0 : i32
    return %c0_i32, %c0_i32_0 : i32, i32
  }
  func.func @transform_5(%arg0: i32) -> (i32, i32) {
    %c0_i32 = arith.constant 0 : i32
    %c0_i32_0 = arith.constant 0 : i32
    return %arg0, %c0_i32 : i32, i32
  }
}

</mosaic_0001>

<bundles_post_ra>
// kernel: tpu_custom_call.1
= control target key start
LH: loop header
LB: loop body
LE: loop exit
PB: predicated region body
PF: predicated region fallthrough
CT: control target
= control target key end

     0   :  { %10 = vsyncpa [#allocation3], 0  ;;  %s3817_s0 = inlined_call_operand.hbm [shape: bf16[8,16,128], index: 0, kind: input, shape index: {}]   ;;  %s3818_s1 = inlined_call_operand.hbm [shape: bf16[128,1408], index: 1, kind: input, shape index: {}]   ;;  %s3819_s2 = inlined_call_operand.hbm [shape: f32[1,512], index: 2, kind: input, shape index: {}]   ;;  %s3820_s3 = inlined_call_operand.hbm [shape: bf16[512,128], index: 3, kind: input, shape index: {}]   ;;  %s3821_s4 = inlined_call_operand.vmem [shape: f32[1,128], index: 4, kind: input, shape index: {}]   ;;  %s3822_s5 = inlined_call_operand.hbm [shape: f32[8,128], index: 5, kind: output, shape index: {}]  }
   0x1   :  { %11 = vsyncpa [#allocation6], 0 }
   0x2   :  { %12 = vsyncpa [#allocation9], 0 }
   0x3   :  { %13 = vsyncpa [#allocation4], 0  ;;  %s3276_s18 = smov [#allocation5]  }
   0x4   :  { %s31_s19 = sshll.u32 %s3276_s18, 4  ;;  %s32_s19 = int_to_ptr.vmem [resolvable:$true] %s31_s19 }
   0x5   :  { %s3176_s20 = scalar_lea.vmem %s32_s19, 11264  ;;  %p3181_p1 = scmp.lt.s32.totalorder %s32_s19, %s32_s19 }
   0x6   :  { %p3177_p0 = scmp.ne.s32.totalorder %s32_s19, %s3176_s20  ;;  %p3182_p2 = scmp.lt.s32.totalorder %s3176_s20, %s3176_s20 }
   0x8   :  { %p3183_p3 = por %p3182_p2, %p3181_p1 }
   0xa   :  { %p3184_p4 = pnand %p3183_p3, %p3177_p0 }
   0xc   :  { %3187 = shalt.err (!%p3184_p4)
}
   0xd   :  { %s3277_s21 = smov 704   ;;  %s3278_s22 = smov 44  }
   0xe   :  { %37 = dma.hbm_to_vmem [thread:$0]  %s3818_s1, 11264, %s32_s19, [#allocation6], %s3277_s21, %s3277_s21, %s3278_s22  }
   0xf   :  { %s3279_s25 = smov [#allocation2]  }
  0x10   :  { %s19_s26 = sshll.u32 %s3279_s25, 4  ;;  %s20_s26 = int_to_ptr.vmem [resolvable:$true] %s19_s26 }
  0x11   :  { %s3196_s27 = scalar_lea.vmem %s20_s26, 1024  ;;  %p3201_p6 = scmp.lt.s32.totalorder %s20_s26, %s20_s26 }
  0x12   :  { %p3197_p5 = scmp.ne.s32.totalorder %s20_s26, %s3196_s27  ;;  %p3202_p7 = scmp.lt.s32.totalorder %s3196_s27, %s3196_s27 }
  0x14   :  { %p3203_p8 = por %p3202_p7, %p3201_p6 }
  0x16   :  { %p3204_p9 = pnand %p3203_p8, %p3197_p5 }
  0x18   :  { %3207 = shalt.err (!%p3204_p9)
}
  0x19   :  { %s3280_s28 = smov 64   ;;  %s3281_s29 = smov 4  }
  0x1a   :  { %25 = dma.hbm_to_vmem [thread:$0]  %s3817_s0, 1024, %s20_s26, [#allocation3], %s3280_s28, %s3280_s28, %s3281_s29  }
  0x1b   :  { %s3282_s7 = smov [#allocation7]   ;;  %s3283_s9 = smov [#allocation8]  }
  0x1c   :  { %s44_s8 = sshll.u32 %s3282_s7, 4  ;;  %s53_s1 = sshll.u32 %s3283_s9, 4  ;;  %s45_s8 = int_to_ptr.vmem [resolvable:$true] %s44_s8  ;;  %s54_s1 = int_to_ptr.vmem [resolvable:$true] %s53_s1 }
  0x1d   :  { %s3216_s10 = scalar_lea.vmem %s45_s8, 64  ;;  %p3221_p11 = scmp.lt.s32.totalorder %s45_s8, %s45_s8 }
  0x1e   :  { %p3217_p10 = scmp.ne.s32.totalorder %s45_s8, %s3216_s10  ;;  %p3222_p12 = scmp.lt.s32.totalorder %s3216_s10, %s3216_s10 }
  0x20   :  { %p3223_p13 = por %p3222_p12, %p3221_p11 }
  0x22   :  { %p3224_p0 = pnand %p3223_p13, %p3217_p10 }
  0x24   :  { %3227 = shalt.err (!%p3224_p0)
}
  0x25   :  { %47 = dma.hbm_to_vmem [thread:$0]  %s3819_s2, 64, %s45_s8, [#allocation6]  }
  0x26   :  { %s3236_s13 = scalar_lea.vmem %s54_s1, 4096  ;;  %p3241_p2 = scmp.lt.s32.totalorder %s54_s1, %s54_s1 }
  0x27   :  { %p3237_p1 = scmp.ne.s32.totalorder %s54_s1, %s3236_s13  ;;  %p3242_p3 = scmp.lt.s32.totalorder %s3236_s13, %s3236_s13 }
  0x29   :  { %p3243_p4 = por %p3242_p3, %p3241_p2 }
  0x2b   :  { %p3244_p5 = pnand %p3243_p4, %p3237_p1 }
  0x2d   :  { %3247 = shalt.err (!%p3244_p5)
}
  0x2e   :  { %59 = dma.hbm_to_vmem [thread:$0]  %s3820_s3, 4096, %s54_s1, [#allocation9], %s3280_s28, %s3280_s28, %s3281_s29  }
  0x2f   :  { %3268 = dma.done.wait [#allocation3], 1024  }
  0x30   :  { %3269 = vsyncadd [#allocation3], 4294966272 }
  0x31   :  { %3270 = dma.done.wait [#allocation6], 11328  }
  0x32   :  { %3271 = vsyncadd [#allocation6], 4294955968 }
  0x33   :  { %3272 = dma.done.wait [#allocation9], 4096  }
  0x34   :  { %3273 = vsyncadd [#allocation9], 4294963200  ;;  %v3284_v0 = vmov 0   ;;  %v3007_v1 = vld [vmem:[#allocation5 + $0x268] ss:$44 sps:$4 sm:$0xff]   ;;  %v3329_v19 = vld [vmem:[#allocation2] sm:$0xff]  }
  0x35   :  { %484 = vmatprep.mubr.bf16.mxu1 %v3284_v0  ;;  %v3008_v2 = vld [vmem:[#allocation5 + $0x270] ss:$44 sps:$4 sm:$0xff]   ;;  %2901 = vmatprep.subr.bf16.mxu0 %v3007_v1  ;;  %v3010_v3 = vld [vmem:[#allocation5 + $0x26c] ss:$44 sps:$4 sm:$0xff]   ;;  %v3014_v6 = vld [vmem:[#allocation5 + $0x214] ss:$44 sps:$4 sm:$0xff]  }
  0x36   :  { %452 = vmatprep.subr.bf16.mxu1 %v3008_v2  ;;  %2902 = vmatpush3.bf16.msra.mxu0 %v3007_v1  ;;  %v3011_v4 = vld [vmem:[#allocation5 + $0x210] ss:$44 sps:$4 sm:$0xff]   ;;  %v3012_v5 = vld [vmem:[#allocation5 + $0x218] ss:$44 sps:$4 sm:$0xff]   ;;  %v3016_v8 = vld [vmem:[#allocation5 + $0x1c0] ss:$44 sps:$4 sm:$0xff]  }
  0x37   :  { %453 = vmatpush1.bf16.msra.mxu1 %v3010_v3  ;;  %2903 = vmatprep.subr.bf16.mxu0 %v3011_v4  ;;  %v3015_v7 = vld [vmem:[#allocation5 + $0x1b8] ss:$44 sps:$4 sm:$0xff]   ;;  %v3018_v9 = vld [vmem:[#allocation5 + $0x1bc] ss:$44 sps:$4 sm:$0xff]   ;;  %v3019_v10 = vld [vmem:[#allocation5 + $0x160] ss:$44 sps:$4 sm:$0xff]  }
  0x38   :  { %454 = vmatprep.subr.bf16.mxu1 %v3012_v5  ;;  %v3020_v11 = vld [vmem:[#allocation5 + $0x168] ss:$44 sps:$4 sm:$0xff]   ;;  %v3022_v12 = vld [vmem:[#allocation5 + $0x164] ss:$44 sps:$4 sm:$0xff]   ;;  %v3026_v15 = vld [vmem:[#allocation5 + $0x10c] ss:$44 sps:$4 sm:$0xff]   ;;  %2917 = vmatprep.mubr.bf16.mxu0 %v3329_v19 }
  0x39   :  { %v3023_v13 = vld [vmem:[#allocation5 + $0x108] ss:$44 sps:$4 sm:$0xff]   ;;  %v3024_v14 = vld [vmem:[#allocation5 + $0x110] ss:$44 sps:$4 sm:$0xff]   ;;  %v3028_v17 = vld [vmem:[#allocation5 + $0xb8] ss:$44 sps:$4 sm:$0xff]  }
  0x3a   :  { %2904 = vmatpush3.bf16.msra.mxu0 %v3011_v4  ;;  %v3027_v16 = vld [vmem:[#allocation5 + $0xb0] ss:$44 sps:$4 sm:$0xff]   ;;  %v3030_v18 = vld [vmem:[#allocation5 + $0xb4] ss:$44 sps:$4 sm:$0xff]   ;;  %v3031_v20 = vld [vmem:[#allocation5 + $0x58] ss:$44 sps:$4 sm:$0xff]  }
  0x3b   :  { %455 = vmatpush1.bf16.msra.mxu1 %v3014_v6  ;;  %2905 = vmatprep.subr.bf16.mxu0 %v3015_v7  ;;  %v3032_v21 = vld [vmem:[#allocation5 + $0x60] ss:$44 sps:$4 sm:$0xff]   ;;  %v3034_v22 = vld [vmem:[#allocation5 + $0x5c] ss:$44 sps:$4 sm:$0xff]   ;;  %v3038_v25 = vld [vmem:[#allocation5 + $0x4] ss:$44 sps:$4 sm:$0xff]  }
  0x3c   :  { %456 = vmatprep.subr.bf16.mxu1 %v3016_v8  ;;  %v3035_v23 = vld [vmem:[#allocation5] ss:$44 sps:$4 sm:$0xff]   ;;  %v3036_v24 = vld [vmem:[#allocation5 + $0x8] ss:$44 sps:$4 sm:$0xff]   ;;  %v3043_v26 = vld [vmem:[#allocation5 + $0x278] ss:$44 sps:$4 sm:$0xff]  }
  0x3d   :  { %v3332_v27 = vld [vmem:[#allocation2 + $0x8] sm:$0xff]   ;;  %v3041_v28 = vld [vmem:[#allocation5 + $0x274] ss:$44 sps:$4 sm:$0xff]   ;;  %v3339_v32 = vld [vmem:[#allocation2 + $0x18] sm:$0xff]   ;;  %vm581_vm0 = vcmask 1046528   ;;  %vm2222_vm1 = vcmask 1041409  }
  0x3e   :  { %2906 = vmatpush3.bf16.msra.mxu0 %v3015_v7  ;;  %v3046_v29 = vld [vmem:[#allocation5 + $0x220] ss:$44 sps:$4 sm:$0xff]   ;;  %v3334_v30 = vld [vmem:[#allocation2 + $0x10] sm:$0xff]   ;;  %v3044_v31 = vld [vmem:[#allocation5 + $0x21c] ss:$44 sps:$4 sm:$0xff]   ;;  %vm2224_vm2 = vcmask 1042434  }
  0x3f   :  { %457 = vmatpush1.bf16.msra.mxu1 %v3018_v9  ;;  %2907 = vmatprep.subr.bf16.mxu0 %v3019_v10  ;;  %v3051_v33 = vld [vmem:[#allocation5 + $0x1c8] ss:$44 sps:$4 sm:$0xff]   ;;  %v3049_v34 = vld [vmem:[#allocation5 + $0x1c4] ss:$44 sps:$4 sm:$0xff]   ;;  %v3076_v39 = vld [vmem:[#allocation5 + $0x1cc] ss:$44 sps:$4 sm:$0xff]  }
  0x40   :  { %458 = vmatprep.subr.bf16.mxu1 %v3020_v11  ;;  %v3071_v35 = vld [vmem:[#allocation5 + $0x27c] ss:$44 sps:$4 sm:$0xff]   ;;  %v3342_v37 = vld [vmem:[#allocation2 + $0x20] sm:$0xff]   ;;  %v3052_v40 = vld [vmem:[#allocation5 + $0x16c] ss:$44 sps:$4 sm:$0xff]   ;;  %vm2226_vm3 = vcmask 1043459  }
  0x41   :  { %v3054_v36 = vld [vmem:[#allocation5 + $0x170] ss:$44 sps:$4 sm:$0xff]   ;;  %v3347_v41 = vld [vmem:[#allocation2 + $0x28] sm:$0xff]   ;;  %v3059_v42 = vld [vmem:[#allocation5 + $0x118] ss:$44 sps:$4 sm:$0xff]   ;;  %vm2228_vm4 = vcmask 1044484  }
  0x42   :  { %2908 = vmatpush3.bf16.msra.mxu0 %v3019_v10  ;;  %v3075_v38 = vld [vmem:[#allocation5 + $0x224] ss:$44 sps:$4 sm:$0xff]   ;;  %v3057_v43 = vld [vmem:[#allocation5 + $0x114] ss:$44 sps:$4 sm:$0xff]   ;;  %v3081_v47 = vld [vmem:[#allocation5 + $0x11c] ss:$44 sps:$4 sm:$0xff]  }
  0x43   :  { %459 = vmatpush1.bf16.msra.mxu1 %v3022_v12  ;;  %2909 = vmatprep.subr.bf16.mxu0 %v3023_v13  ;;  %v3080_v44 = vld [vmem:[#allocation5 + $0x174] ss:$44 sps:$4 sm:$0xff]   ;;  %v3060_v48 = vld [vmem:[#allocation5 + $0xbc] ss:$44 sps:$4 sm:$0xff]   ;;  %v3085_v51 = vld [vmem:[#allocation5 + $0xc4] ss:$44 sps:$4 sm:$0xff]  }
  0x44   :  { %460 = vmatprep.subr.bf16.mxu1 %v3024_v14  ;;  %v3062_v45 = vld [vmem:[#allocation5 + $0xc0] ss:$44 sps:$4 sm:$0xff]   ;;  %v3350_v46 = vld [vmem:[#allocation2 + $0x30] sm:$0xff]   ;;  %v3356_v50 = vld [vmem:[#allocation2 + $0x38] sm:$0xff]   ;;  %vm2230_vm5 = vcmask 1045509   ;;  %vm2232_vm6 = vcmask 1046534  }
  0x45   :  { %v3067_v49 = vld [vmem:[#allocation5 + $0x68] ss:$44 sps:$4 sm:$0xff]   ;;  %v3065_v52 = vld [vmem:[#allocation5 + $0x64] ss:$44 sps:$4 sm:$0xff]   ;;  %v3086_v54 = vld [vmem:[#allocation5 + $0x6c] ss:$44 sps:$4 sm:$0xff]  }
  0x46   :  { %2910 = vmatpush3.bf16.msra.mxu0 %v3023_v13  ;;  %v3070_v53 = vld [vmem:[#allocation5 + $0x10] ss:$44 sps:$4 sm:$0xff]   ;;  %v3068_v55 = vld [vmem:[#allocation5 + $0xc] ss:$44 sps:$4 sm:$0xff]   ;;  %v3090_v57 = vld [vmem:[#allocation5 + $0x14] ss:$44 sps:$4 sm:$0xff]  }
  0x47   :  { %461 = vmatpush1.bf16.msra.mxu1 %v3026_v15  ;;  %2911 = vmatprep.subr.bf16.mxu0 %v3027_v16  ;;  %v3074_v56 = vld [vmem:[#allocation5 + $0x284] ss:$44 sps:$4 sm:$0xff]   ;;  %v3072_v58 = vld [vmem:[#allocation5 + $0x280] ss:$44 sps:$4 sm:$0xff]   ;;  %v3077_v61 = vld [vmem:[#allocation5 + $0x228] ss:$44 sps:$4 sm:$0xff]  }
  0x48   :  { %462 = vmatprep.subr.bf16.mxu1 %v3028_v17  ;;  %v3079_v59 = vld [vmem:[#allocation5 + $0x22c] ss:$44 sps:$4 sm:$0xff]   ;;  %v3084_v62 = vld [vmem:[#allocation5 + $0x1d4] ss:$44 sps:$4 sm:$0xff]   ;;  %v3082_v63 = vld [vmem:[#allocation5 + $0x1d0] ss:$44 sps:$4 sm:$0xff]  }
  0x49   :  { %v3096_v60 = vld [vmem:[#allocation5 + $0x28c] ss:$44 sps:$4 sm:$0xff]   ;;  %v3089_v1 = vld [vmem:[#allocation5 + $0x17c] ss:$44 sps:$4 sm:$0xff]   ;;  %v3093_v3 = vld [vmem:[#allocation5 + $0x124] ss:$44 sps:$4 sm:$0xff]  }
  0x4a   :  { %2912 = vmatpush3.bf16.msra.mxu0 %v3027_v16  ;;  %v3087_v2 = vld [vmem:[#allocation5 + $0x178] ss:$44 sps:$4 sm:$0xff]   ;;  %v3091_v4 = vld [vmem:[#allocation5 + $0x120] ss:$44 sps:$4 sm:$0xff]   ;;  %v3097_v6 = vld [vmem:[#allocation5 + $0xc8] ss:$44 sps:$4 sm:$0xff]  }
  0x4b   :  { %463 = vmatpush1.bf16.msra.mxu1 %v3030_v18  ;;  %2913 = vmatprep.subr.bf16.mxu0 %v3031_v20  ;;  %v3099_v5 = vld [vmem:[#allocation5 + $0xcc] ss:$44 sps:$4 sm:$0xff]   ;;  %v3108_v7 = vld [vmem:[#allocation5 + $0x74] ss:$44 sps:$4 sm:$0xff]   ;;  %v3106_v8 = vld [vmem:[#allocation5 + $0x70] ss:$44 sps:$4 sm:$0xff]  }
  0x4c   :  { %464 = vmatprep.subr.bf16.mxu1 %v3032_v21  ;;  %v3117_v9 = vld [vmem:[#allocation5 + $0x1c] ss:$44 sps:$4 sm:$0xff]   ;;  %v3115_v10 = vld [vmem:[#allocation5 + $0x18] ss:$44 sps:$4 sm:$0xff]   ;;  %v3102_v13 = vld [vmem:[#allocation5 + $0x234] ss:$44 sps:$4 sm:$0xff]  }
  0x4d   :  { %v3127_v11 = vld [vmem:[#allocation5 + $0x290] ss:$44 sps:$4 sm:$0xff]   ;;  %v3094_v12 = vld [vmem:[#allocation5 + $0x288] ss:$44 sps:$4 sm:$0xff]   ;;  %v3103_v16 = vld [vmem:[#allocation5 + $0x1d8] ss:$44 sps:$4 sm:$0xff]  }
  0x4e   :  { %2914 = vmatpush3.bf16.msra.mxu0 %v3031_v20  ;;  %v3100_v14 = vld [vmem:[#allocation5 + $0x230] ss:$44 sps:$4 sm:$0xff]   ;;  %v3109_v18 = vld [vmem:[#allocation5 + $0x180] ss:$44 sps:$4 sm:$0xff]   ;;  %v3112_v21 = vld [vmem:[#allocation5 + $0x128] ss:$44 sps:$4 sm:$0xff]  }
  0x4f   :  { %465 = vmatpush1.bf16.msra.mxu1 %v3034_v22  ;;  %2915 = vmatprep.subr.bf16.mxu0 %v3035_v23  ;;  %v3105_v15 = vld [vmem:[#allocation5 + $0x1dc] ss:$44 sps:$4 sm:$0xff]   ;;  %v3111_v17 = vld [vmem:[#allocation5 + $0x184] ss:$44 sps:$4 sm:$0xff]   ;;  %v3114_v20 = vld [vmem:[#allocation5 + $0x12c] ss:$44 sps:$4 sm:$0xff]  }
  0x50   :  { %466 = vmatprep.subr.bf16.mxu1 %v3036_v24  ;;  %v3120_v22 = vld [vmem:[#allocation5 + $0xd4] ss:$44 sps:$4 sm:$0xff]   ;;  %v3123_v24 = vld [vmem:[#allocation5 + $0x7c] ss:$44 sps:$4 sm:$0xff]   ;;  %vm2234_vm7 = vcmask 1047559   ;;  %vm1160_vm8 = vcmask 1045504  }
  0x51   :  { %vm2020_vm9 = vcmask 1044480   ;;  %vm2093_vm10 = vcmask 1043456   ;;  %s3285_s15 = smov [#allocation10]  }
  0x52   :  { %2916 = vmatpush3.bf16.msra.mxu0 %v3035_v23  ;;  %v3118_v23 = vld [vmem:[#allocation5 + $0xd0] ss:$44 sps:$4 sm:$0xff]   ;;  %s2669_s16 = sshll.u32 %s3285_s15, 4  ;;  %s2670_s16 = int_to_ptr.vmem [resolvable:$true] %s2669_s16 }
  0x53   :  { %467 = vmatpush1.bf16.msra.mxu1 %v3038_v25  ;;  %862 = vmatprep.subr.bf16.mxu0 %v3043_v26  ;;  %v3121_v25 = vld [vmem:[#allocation5 + $0x78] ss:$44 sps:$4 sm:$0xff]   ;;  %s3248_s17 = scalar_lea.vmem %s2670_s16, 128  ;;  %p3253_p7 = scmp.lt.s32.totalorder %s2670_s16, %s2670_s16 }
  0x54   :  { %2933 = vmatprep.subr.bf16.mxu1 %v3071_v35  ;;  %v3126_v26 = vld [vmem:[#allocation5 + $0x24] ss:$44 sps:$4 sm:$0xff]   ;;  %p3249_p6 = scmp.ne.s32.totalorder %s2670_s16, %s3248_s17  ;;  %p3254_p8 = scmp.lt.s32.totalorder %s3248_s17, %s3248_s17 }
  0x55   :  { %2918 = vmatmul.mubr.bf16.vlgmr.msra.gmra.mxu0 %v3332_v27 }
  0x56   :  { %485 = vmatmul.mubr.bf16.vlgmr.msra.gmra.mxu1 %v3329_v19  ;;  %863 = vmatpush1.bf16.msra.mxu0 %v3041_v28  ;;  %v3124_v28 = vld [vmem:[#allocation5 + $0x20] ss:$44 sps:$4 sm:$0xff]   ;;  %p3255_p9 = por %p3254_p8, %p3253_p7 }
  0x57   :  { %864 = vmatprep.subr.bf16.mxu0 %v3046_v29  ;;  %2921 = vmatprep.mubr.bf16.mxu0 %v3334_v30  ;;  %v3128_v29 = vld [vmem:[#allocation5 + $0x238] ss:$44 sps:$4 sm:$0xff]  }
  0x58   :  { %494 = vmatprep.mubr.bf16.mxu1 %v3284_v0  ;;  %2934 = vmatpush3.bf16.msra.mxu1 %v3071_v35  ;;  %v3132_v35 = vld [vmem:[#allocation5 + $0xd8] ss:$44 sps:$4 sm:$0xff]   ;;  %p3256_p10 = pnand %p3255_p9, %p3249_p6 }
  0x59   :  { %2935 = vmatprep.subr.bf16.mxu1 %v3075_v38 }
  0x5a   :  { %865 = vmatpush1.bf16.msra.mxu0 %v3044_v31  ;;  %v3129_v31 = vld [vmem:[#allocation5 + $0x1e0] ss:$44 sps:$4 sm:$0xff]  }
  0x5b   :  { %866 = vmatprep.subr.bf16.mxu0 %v3051_v33  ;;  %v3130_v33 = vld [vmem:[#allocation5 + $0x188] ss:$44 sps:$4 sm:$0xff]  }
  0x5c   :  { %2936 = vmatpush3.bf16.msra.mxu1 %v3075_v38  ;;  %v3134_v38 = vld [vmem:[#allocation5 + $0x28] ss:$44 sps:$4 sm:$0xff]  }
  0x5d   :  { %2922 = vmatmul.mubr.bf16.gmra.mxu0 %v3339_v32  ;;  %2937 = vmatprep.subr.bf16.mxu1 %v3076_v39 }
  0x5e   :  { %495 = vmatmul.mubr.bf16.gmra.mxu1 %v3332_v27  ;;  %867 = vmatpush1.bf16.msra.mxu0 %v3049_v34  ;;  %v3131_v34 = vld [vmem:[#allocation5 + $0x130] ss:$44 sps:$4 sm:$0xff]  }
  0x5f   :  { %868 = vmatprep.subr.bf16.mxu0 %v3054_v36  ;;  %2925 = vmatprep.mubr.bf16.mxu0 %v3342_v37  ;;  %v3133_v36 = vld [vmem:[#allocation5 + $0x80] ss:$44 sps:$4 sm:$0xff]  }
  0x60   :  { %504 = vmatprep.mubr.bf16.mxu1 %v3284_v0  ;;  %2938 = vmatpush3.bf16.msra.mxu1 %v3076_v39  ;;  %v3135_v39 = vld [vmem:[#allocation8 + $0x78] sm:$0xff]  }
  0x61   :  { %2939 = vmatprep.subr.bf16.mxu1 %v3080_v44 }
  0x62   :  { %869 = vmatpush1.bf16.msra.mxu0 %v3052_v40  ;;  %v3136_v40 = vld [vmem:[#allocation8 + $0x38] sm:$0xff]  }
  0x63   :  { %870 = vmatprep.subr.bf16.mxu0 %v3059_v42  ;;  %v3137_v42 = vld [vmem:[#allocation8 + $0x70] sm:$0xff]  }
  0x64   :  { %2940 = vmatpush3.bf16.msra.mxu1 %v3080_v44  ;;  %v3139_v44 = vld [vmem:[#allocation8 + $0x68] sm:$0xff]  }
  0x65   :  { %2926 = vmatmul.mubr.bf16.gmra.mxu0 %v3347_v41  ;;  %2941 = vmatprep.subr.bf16.mxu1 %v3081_v47 }
  0x66   :  { %505 = vmatmul.mubr.bf16.gmra.mxu1 %v3334_v30  ;;  %871 = vmatpush1.bf16.msra.mxu0 %v3057_v43  ;;  %v3138_v43 = vld [vmem:[#allocation8 + $0x30] sm:$0xff]  }
  0x67   :  { %872 = vmatprep.subr.bf16.mxu0 %v3062_v45  ;;  %2929 = vmatprep.mubr.bf16.mxu0 %v3350_v46  ;;  %v3140_v45 = vld [vmem:[#allocation8 + $0x28] sm:$0xff]  }
  0x68   :  { %514 = vmatprep.mubr.bf16.mxu1 %v3284_v0  ;;  %2942 = vmatpush3.bf16.msra.mxu1 %v3081_v47  ;;  %v3141_v47 = vld [vmem:[#allocation8 + $0x60] sm:$0xff]  }
  0x69   :  { %2943 = vmatprep.subr.bf16.mxu1 %v3085_v51 }
  0x6a   :  { %873 = vmatpush1.bf16.msra.mxu0 %v3060_v48  ;;  %v3142_v48 = vld [vmem:[#allocation8 + $0x20] sm:$0xff]  }
  0x6b   :  { %874 = vmatprep.subr.bf16.mxu0 %v3067_v49  ;;  %v3143_v49 = vld [vmem:[#allocation8 + $0x58] sm:$0xff]  }
  0x6c   :  { %2944 = vmatpush3.bf16.msra.mxu1 %v3085_v51  ;;  %v3144_v51 = vld [vmem:[#allocation8 + $0x18] sm:$0xff]  }
  0x6d   :  { %2930 = vmatmul.mubr.bf16.gmra.mxu0 %v3356_v50  ;;  %2945 = vmatprep.subr.bf16.mxu1 %v3086_v54 }
  0x6e   :  { %515 = vmatmul.mubr.bf16.gmra.mxu1 %v3339_v32  ;;  %875 = vmatpush1.bf16.msra.mxu0 %v3065_v52  ;;  %v3145_v52 = vld [vmem:[#allocation8 + $0x50] sm:$0xff]  }
  0x6f   :  { %876 = vmatprep.subr.bf16.mxu0 %v3070_v53  ;;  %524 = vmatprep.mubr.bf16.mxu1 %v3284_v0  ;;  %v3146_v53 = vld [vmem:[#allocation8 + $0x10] sm:$0xff]  }
  0x70   :  { %894 = vmatprep.mubr.bf16.mxu0 %v3284_v0  ;;  %2946 = vmatpush3.bf16.msra.mxu1 %v3086_v54  ;;  %v3147_v54 = vld [vmem:[#allocation8 + $0x48] sm:$0xff]  }
  0x71   :  { %2947 = vmatprep.subr.bf16.mxu1 %v3090_v57 }
  0x72   :  { %877 = vmatpush1.bf16.msra.mxu0 %v3068_v55  ;;  %v3148_v55 = vld [vmem:[#allocation8 + $0x8] sm:$0xff]  }
  0x73   :  { %1537 = vmatprep.subr.bf16.mxu0 %v3074_v56  ;;  %v3149_v56 = vld [vmem:[#allocation8 + $0x40] sm:$0xff]  }
  0x74   :  { %2948 = vmatpush3.bf16.msra.mxu1 %v3090_v57  ;;  %v3150_v57 = vld [vmem:[#allocation8] sm:$0xff]  }
  0x75   :  { %895 = vmatmul.mubr.bf16.vlgmr.msra.gmra.mxu0 %v3329_v19  ;;  %1650 = vmatprep.subr.bf16.mxu1 %v3096_v60 }
  0x76   :  { %525 = vmatmul.mubr.bf16.gmra.mxu1 %v3342_v37  ;;  %1538 = vmatpush1.bf16.msra.mxu0 %v3072_v58 }
  0x77   :  { %534 = vmatprep.mubr.bf16.mxu1 %v3284_v0  ;;  %904 = vmatprep.mubr.bf16.mxu0 %v3284_v0 }
  0x78   :  { %1539 = vmatprep.subr.bf16.mxu0 %v3079_v59 }
  0x7a   :  { %1540 = vmatpush1.bf16.msra.mxu0 %v3077_v61 }
  0x7b   :  { %1541 = vmatprep.subr.bf16.mxu0 %v3084_v62 }
  0x7d   :  { %905 = vmatmul.mubr.bf16.gmra.mxu0 %v3332_v27 }
  0x7e   :  { %535 = vmatmul.mubr.bf16.gmra.mxu1 %v3347_v41  ;;  %914 = vmatprep.mubr.bf16.mxu0 %v3284_v0 }
  0x7f   :  { %544 = vmatprep.mubr.bf16.mxu1 %v3284_v0  ;;  %1542 = vmatpush1.bf16.msra.mxu0 %v3082_v63 }
  0x80   :  { %1543 = vmatprep.subr.bf16.mxu0 %v3089_v1 }
  0x83   :  { %1544 = vmatpush1.bf16.msra.mxu0 %v3087_v2 }
  0x84   :  { %1545 = vmatprep.subr.bf16.mxu0 %v3093_v3 }
  0x85   :  { %915 = vmatmul.mubr.bf16.gmra.mxu0 %v3334_v30 }
  0x86   :  { %545 = vmatmul.mubr.bf16.gmra.mxu1 %v3350_v46  ;;  %924 = vmatprep.mubr.bf16.mxu0 %v3284_v0 }
  0x87   :  { %554 = vmatprep.mubr.bf16.mxu1 %v3284_v0  ;;  %1546 = vmatpush1.bf16.msra.mxu0 %v3091_v4 }
  0x88   :  { %1547 = vmatprep.subr.bf16.mxu0 %v3099_v5 }
  0x8b   :  { %1548 = vmatpush1.bf16.msra.mxu0 %v3097_v6 }
  0x8c   :  { %1549 = vmatprep.subr.bf16.mxu0 %v3108_v7 }
  0x8d   :  { %925 = vmatmul.mubr.bf16.gmra.mxu0 %v3339_v32 }
  0x8e   :  { %555 = vmatmul.mubr.bf16.gmra.mxu1 %v3356_v50  ;;  %934 = vmatprep.mubr.bf16.mxu0 %v3284_v0 }
  0x8f   :  { %2949 = vmatprep.mubr.bf16.mxu1 %v3329_v19  ;;  %1550 = vmatpush1.bf16.msra.mxu0 %v3106_v8 }
  0x90   :  { %1551 = vmatprep.subr.bf16.mxu0 %v3117_v9 }
  0x93   :  { %1552 = vmatpush1.bf16.msra.mxu0 %v3115_v10 }
  0x94   :  { %2965 = vmatprep.subr.bf16.mxu0 %v3127_v11 }
  0x95   :  { %935 = vmatmul.mubr.bf16.gmra.mxu0 %v3342_v37 }
  0x96   :  { %2950 = vmatmul.mubr.bf16.vlgmr.msra.gmra.mxu1 %v3332_v27  ;;  %944 = vmatprep.mubr.bf16.mxu0 %v3284_v0 }
  0x97   :  { %1651 = vmatpush1.bf16.msra.mxu1 %v3094_v12  ;;  %2953 = vmatprep.mubr.bf16.mxu1 %v3334_v30 }
  0x98   :  { %1652 = vmatprep.subr.bf16.mxu1 %v3102_v13 }
  0x9b   :  { %1653 = vmatpush1.bf16.msra.mxu1 %v3100_v14 }
  0x9c   :  { %1654 = vmatprep.subr.bf16.mxu1 %v3105_v15 }
  0x9d   :  { %945 = vmatmul.mubr.bf16.gmra.mxu0 %v3347_v41 }
  0x9e   :  { %2954 = vmatmul.mubr.bf16.gmra.mxu1 %v3339_v32  ;;  %954 = vmatprep.mubr.bf16.mxu0 %v3284_v0 }
  0x9f   :  { %1655 = vmatpush1.bf16.msra.mxu1 %v3103_v16  ;;  %2957 = vmatprep.mubr.bf16.mxu1 %v3342_v37 }
  0xa0   :  { %1656 = vmatprep.subr.bf16.mxu1 %v3111_v17 }
  0xa3   :  { %1657 = vmatpush1.bf16.msra.mxu1 %v3109_v18 }
  0xa4   :  { %1658 = vmatprep.subr.bf16.mxu1 %v3114_v20 }
  0xa5   :  { %955 = vmatmul.mubr.bf16.gmra.mxu0 %v3350_v46 }
  0xa6   :  { %2958 = vmatmul.mubr.bf16.gmra.mxu1 %v3347_v41  ;;  %964 = vmatprep.mubr.bf16.mxu0 %v3284_v0 }
  0xa7   :  { %1659 = vmatpush1.bf16.msra.mxu1 %v3112_v21  ;;  %2961 = vmatprep.mubr.bf16.mxu1 %v3350_v46 }
  0xa8   :  { %1660 = vmatprep.subr.bf16.mxu1 %v3120_v22 }
  0xab   :  { %1661 = vmatpush1.bf16.msra.mxu1 %v3118_v23 }
  0xac   :  { %1662 = vmatprep.subr.bf16.mxu1 %v3123_v24 }
  0xad   :  { %965 = vmatmul.mubr.bf16.gmra.mxu0 %v3356_v50 }
  0xae   :  { %2962 = vmatmul.mubr.bf16.gmra.mxu1 %v3356_v50  ;;  %1569 = vmatprep.mubr.bf16.mxu0 %v3284_v0 }
  0xaf   :  { %1663 = vmatpush1.bf16.msra.mxu1 %v3121_v25  ;;  %1682 = vmatprep.mubr.bf16.mxu1 %v3284_v0 }
  0xb0   :  { %1664 = vmatprep.subr.bf16.mxu1 %v3126_v26 }
  0xb3   :  { %1665 = vmatpush1.bf16.msra.mxu1 %v3124_v28 }
  0xb4   :  { %2857 = vmatprep.subr.bf16.mxu1 %v3135_v39 }
  0xb5   :  { %1570 = vmatmul.mubr.bf16.vlgmr.msra.gmra.mxu0 %v3329_v19 }
  0xb6   :  { %2966 = vmatpush3.bf16.msra.mxu0 %v3127_v11  ;;  %1683 = vmatmul.mubr.bf16.vlgmr.msra.gmra.mxu1 %v3329_v19 }
  0xb7   :  { %1579 = vmatprep.mubr.bf16.mxu0 %v3284_v0  ;;  %2967 = vmatprep.subr.bf16.mxu0 %v3128_v29 }
  0xb8   :  { %1692 = vmatprep.mubr.bf16.mxu1 %v3284_v0  ;;  %2858 = vmatpush3.bf16.msra.mxu1 %v3136_v40 }
  0xb9   :  { %2859 = vmatprep.subr.bf16.mxu1 %v3137_v42 }
  0xba   :  { %2968 = vmatpush3.bf16.msra.mxu0 %v3128_v29 }
  0xbb   :  { %2969 = vmatprep.subr.bf16.mxu0 %v3129_v31 }
  0xbc   :  { %2860 = vmatpush3.bf16.msra.mxu1 %v3138_v43 }
  0xbd   :  { %1580 = vmatmul.mubr.bf16.gmra.mxu0 %v3332_v27  ;;  %2861 = vmatprep.subr.bf16.mxu1 %v3139_v44 }
  0xbe   :  { %1693 = vmatmul.mubr.bf16.gmra.mxu1 %v3332_v27  ;;  %1589 = vmatprep.mubr.bf16.mxu0 %v3284_v0 }
  0xbf   :  { %2970 = vmatpush3.bf16.msra.mxu0 %v3129_v31  ;;  %1702 = vmatprep.mubr.bf16.mxu1 %v3284_v0 }
  0xc0   :  { %2971 = vmatprep.subr.bf16.mxu0 %v3130_v33  ;;  %2862 = vmatpush3.bf16.msra.mxu1 %v3140_v45 }
  0xc1   :  { %2863 = vmatprep.subr.bf16.mxu1 %v3141_v47 }
  0xc3   :  { %2972 = vmatpush3.bf16.msra.mxu0 %v3130_v33 }
  0xc4   :  { %2973 = vmatprep.subr.bf16.mxu0 %v3131_v34  ;;  %2864 = vmatpush3.bf16.msra.mxu1 %v3142_v48 }
  0xc5   :  { %1590 = vmatmul.mubr.bf16.gmra.mxu0 %v3334_v30  ;;  %2865 = vmatprep.subr.bf16.mxu1 %v3143_v49 }
  0xc6   :  { %1703 = vmatmul.mubr.bf16.gmra.mxu1 %v3334_v30  ;;  %1599 = vmatprep.mubr.bf16.mxu0 %v3284_v0 }
  0xc7   :  { %1712 = vmatprep.mubr.bf16.mxu1 %v3284_v0  ;;  %2974 = vmatpush3.bf16.msra.mxu0 %v3131_v34 }
  0xc8   :  { %2975 = vmatprep.subr.bf16.mxu0 %v3132_v35  ;;  %2866 = vmatpush3.bf16.msra.mxu1 %v3144_v51 }
  0xc9   :  { %2867 = vmatprep.subr.bf16.mxu1 %v3145_v52 }
  0xcb   :  { %2976 = vmatpush3.bf16.msra.mxu0 %v3132_v35 }
  0xcc   :  { %2977 = vmatprep.subr.bf16.mxu0 %v3133_v36  ;;  %2868 = vmatpush3.bf16.msra.mxu1 %v3146_v53 }
  0xcd   :  { %1600 = vmatmul.mubr.bf16.gmra.mxu0 %v3339_v32  ;;  %2869 = vmatprep.subr.bf16.mxu1 %v3147_v54 }
  0xce   :  { %1713 = vmatmul.mubr.bf16.gmra.mxu1 %v3339_v32  ;;  %1609 = vmatprep.mubr.bf16.mxu0 %v3284_v0 }
  0xcf   :  { %1722 = vmatprep.mubr.bf16.mxu1 %v3284_v0  ;;  %2978 = vmatpush3.bf16.msra.mxu0 %v3133_v36 }
  0xd0   :  { %2979 = vmatprep.subr.bf16.mxu0 %v3134_v38  ;;  %2870 = vmatpush3.bf16.msra.mxu1 %v3148_v55 }
  0xd1   :  { %2871 = vmatprep.subr.bf16.mxu1 %v3149_v56 }
  0xd3   :  { %2980 = vmatpush3.bf16.msra.mxu0 %v3134_v38 }
  0xd4   :  { %2872 = vmatpush3.bf16.msra.mxu1 %v3150_v57 }
  0xd5   :  { %1610 = vmatmul.mubr.bf16.gmra.mxu0 %v3342_v37 }
  0xd6   :  { %1723 = vmatmul.mubr.bf16.gmra.mxu1 %v3342_v37  ;;  %1619 = vmatprep.mubr.bf16.mxu0 %v3284_v0 }
  0xd7   :  { %1732 = vmatprep.mubr.bf16.mxu1 %v3284_v0 }
  0xdd   :  { %1620 = vmatmul.mubr.bf16.gmra.mxu0 %v3347_v41 }
  0xde   :  { %1733 = vmatmul.mubr.bf16.gmra.mxu1 %v3347_v41  ;;  %1629 = vmatprep.mubr.bf16.mxu0 %v3284_v0 }
  0xdf   :  { %1742 = vmatprep.mubr.bf16.mxu1 %v3284_v0 }
  0xe5   :  { %1630 = vmatmul.mubr.bf16.gmra.mxu0 %v3350_v46 }
  0xe6   :  { %1743 = vmatmul.mubr.bf16.gmra.mxu1 %v3350_v46  ;;  %1639 = vmatprep.mubr.bf16.mxu0 %v3284_v0 }
  0xe7   :  { %1752 = vmatprep.mubr.bf16.mxu1 %v3284_v0 }
  0xed   :  { %1640 = vmatmul.mubr.bf16.gmra.mxu0 %v3356_v50 }
  0xee   :  { %1753 = vmatmul.mubr.bf16.gmra.mxu1 %v3356_v50  ;;  %2981 = vmatprep.mubr.bf16.mxu0 %v3329_v19 }
  0xf5   :  { %2982 = vmatmul.mubr.bf16.vlgmr.msra.gmra.mxu0 %v3332_v27 }
  0xf6   :  { %2985 = vmatprep.mubr.bf16.mxu0 %v3334_v30 }
  0xfd   :  { %2986 = vmatmul.mubr.bf16.gmra.mxu0 %v3339_v32 }
  0xfe   :  { %2989 = vmatprep.mubr.bf16.mxu0 %v3342_v37 }
 0x105   :  { %2990 = vmatmul.mubr.bf16.gmra.mxu0 %v3347_v41 }
 0x106   :  { %2993 = vmatprep.mubr.bf16.mxu0 %v3350_v46 }
 0x10d   :  { %2994 = vmatmul.mubr.bf16.gmra.mxu0 %v3356_v50 }
 0x115   :  { %v2919_v0 = vpop.f32.mrf.mxu0 }
 0x116   :  { %v486_v58 = vpop.f32.mrf.mxu1 }
 0x117   :  { %v237_v19 = vpop.f32.mrf.mxu0 }
 0x118   :  { %v488_v59 = vpop.f32.mrf.mxu1 }
 0x119   :  { %v2920_v60 = vpop.f32.mrf.mxu0  ;;  %v582_v10 = vrot.slane %v488_v59, 1 }
 0x11a   :  { %v307_v61 = vmax.f32 %v2919_v0, %v2920_v60  ;;  %v490_v62 = vpop.f32.mrf.mxu1 }
 0x11b   :  { %v240_v27 = vpop.f32.mrf.mxu0 }
 0x11c   :  { %v308_v63 = vrot.slane %v307_v61, 4  ;;  %v300_v30 = vmax.f32 %v237_v19, %v240_v27  ;;  %v492_v1 = vpop.f32.mrf.mxu1 }
 0x11d   :  { %v2923_v32 = vpop.f32.mrf.mxu0  ;;  %v583_v11 = vrot.slane %v492_v1, 1 }
 0x11e   :  { %v309_v2 = vmax.f32 %v307_v61, %v308_v63  ;;  %v301_v37 = vrot.slane %v300_v30, 4  ;;  %v496_v3 = vpop.f32.mrf.mxu1 }
 0x11f   :  { %v253_v41 = vpop.f32.mrf.mxu0  ;;  %v584_v23 = vsel %vm581_vm0, %v582_v10, %v583_v11  ;;  %v623_v33 = vadd.f32 %v583_v11, %v490_v62 }
 0x120   :  { %v310_v4 = vrot.slane %v309_v2, 2  ;;  %v302_v46 = vmax.f32 %v300_v30, %v301_v37  ;;  %v498_v5 = vpop.f32.mrf.mxu1  ;;  %v622_v43 = vadd.f32 %v584_v23, %v486_v58 }
 0x121   :  { %v2924_v50 = vpop.f32.mrf.mxu0  ;;  %v585_v24 = vrot.slane %v498_v5, 1  ;;  %v638_v49 = vsel %vm581_vm0, %v623_v33, -inf }
 0x122   :  { %v311_v6 = vmax.f32 %v309_v2, %v310_v4  ;;  %v303_v7 = vrot.slane %v302_v46, 2  ;;  %v321_v8 = vmax.f32 %v2923_v32, %v2924_v50  ;;  %v500_v9 = vpop.f32.mrf.mxu1  ;;  %v639_v57 = vmax.f32 %v622_v43, %v638_v49 }
 0x123   :  { %v256_v12 = vpop.f32.mrf.mxu0  ;;  %v2287_v43 = vlaneseq }
 0x124   :  { %v312_v13 = vrot.slane %v311_v6, 1  ;;  %v304_v14 = vmax.f32 %v302_v46, %v303_v7  ;;  %v322_v15 = vrot.slane %v321_v8, 4  ;;  %v502_v16 = vpop.f32.mrf.mxu1  ;;  %v314_v17 = vmax.f32 %v253_v41, %v256_v12 }
 0x125   :  { %v2927_v18 = vpop.f32.mrf.mxu0  ;;  %v586_v26 = vrot.slane %v502_v16, 1  ;;  %v640_v32 = vrot.slane %v639_v57, 4 }
 0x126   :  { %v305_v20 = vrot.slane %v304_v14, 1  ;;  %v323_v21 = vmax.f32 %v321_v8, %v322_v15  ;;  %v506_v22 = vpop.f32.mrf.mxu1  ;;  %v315_v25 = vrot.slane %v314_v17, 4  ;;  %v313_v29 = vmax.f32 %v311_v6, %v312_v13 }
 0x127   :  { %v269_v28 = vpop.f32.mrf.mxu0  ;;  %v587_v45 = vsel %vm581_vm0, %v585_v24, %v586_v26  ;;  %v625_v47 = vadd.f32 %v586_v26, %v500_v9  ;;  %v641_v11 = vmax.f32 %v639_v57, %v640_v32 }
 0x128   :  { %v306_v31 = vmax.f32 %v304_v14, %v305_v20  ;;  %v324_v34 = vrot.slane %v323_v21, 2  ;;  %v508_v35 = vpop.f32.mrf.mxu1  ;;  %v316_v36 = vmax.f32 %v314_v17, %v315_v25  ;;  %v624_v55 = vadd.f32 %v587_v45, %v496_v3 }
 0x129   :  { %v2928_v38 = vpop.f32.mrf.mxu0  ;;  %v646_v19 = vsel %vm581_vm0, %v625_v47, -inf  ;;  %v588_v63 = vrot.slane %v508_v35, 1  ;;  %v642_v26 = vrot.slane %v641_v11, 2 }
 0x12a   :  { %v2223_v39 = vsel %vm2222_vm1, %v313_v29, %v306_v31  ;;  %v325_v40 = vmax.f32 %v323_v21, %v324_v34  ;;  %v510_v42 = vpop.f32.mrf.mxu1  ;;  %v317_v44 = vrot.slane %v316_v36, 2  ;;  %v647_v27 = vmax.f32 %v624_v55, %v646_v19 }
 0x12b   :  { %v272_v48 = vpop.f32.mrf.mxu0  ;;  %v335_v3 = vmax.f32 %v2927_v18, %v2928_v38 }
 0x12c   :  { %v512_v51 = vpop.f32.mrf.mxu1  ;;  %v318_v52 = vmax.f32 %v316_v36, %v317_v44  ;;  %v326_v54 = vrot.slane %v325_v40, 1  ;;  %v328_v5 = vmax.f32 %v269_v28, %v272_v48  ;;  %v648_v7 = vrot.slane %v647_v27, 4 }
 0x12d   :  { %v3436_v53 = vpop.f32.mrf.mxu0  ;;  %v589_v30 = vrot.slane %v512_v51, 1  ;;  %v336_v13 = vrot.slane %v335_v3, 4  ;;  %v643_v51 = vmax.f32 %v641_v11, %v642_v26 }
 0x12e   :  { %v516_v56 = vpop.f32.mrf.mxu1  ;;  %v319_v0 = vrot.slane %v318_v52, 1  ;;  %v327_v62 = vmax.f32 %v325_v40, %v326_v54  ;;  %v329_v16 = vrot.slane %v328_v5, 4  ;;  %v649_v21 = vmax.f32 %v647_v27, %v648_v7 }
 0x12f   :  { %v285_v59 = vpop.f32.mrf.mxu0  ;;  %v590_v8 = vsel %vm581_vm0, %v588_v63, %v589_v30  ;;  %v627_v9 = vadd.f32 %v589_v30, %v510_v42  ;;  %v337_v33 = vmax.f32 %v335_v3, %v336_v13 }
 0x130   :  { %v518_v58 = vpop.f32.mrf.mxu1  ;;  %v320_v60 = vmax.f32 %v318_v52, %v319_v0  ;;  %v626_v17 = vadd.f32 %v590_v8, %v506_v22  ;;  %v650_v44 = vrot.slane %v649_v21, 2 }
 0x131   :  { %v3439_v61 = vpop.f32.mrf.mxu0  ;;  %v591_v4 = vrot.slane %v518_v58, 1  ;;  %v654_v23 = vsel %vm581_vm0, %v627_v9, -inf  ;;  %v338_v57 = vrot.slane %v337_v33, 2 }
 0x132   :  { %v520_v1 = vpop.f32.mrf.mxu1  ;;  %v2225_v2 = vsel %vm2224_vm2, %v320_v60, %v2223_v39  ;;  %v330_v39 = vmax.f32 %v328_v5, %v329_v16  ;;  %v655_v40 = vmax.f32 %v626_v17, %v654_v23  ;;  %v651_v30 = vmax.f32 %v649_v21, %v650_v44 }
 0x133   :  { %v288_v37 = vpop.f32.mrf.mxu0  ;;  %v3443_v41 = vsel %vm2226_vm3, %v327_v62, %v2225_v2  ;;  %v349_v62 = vmax.f32 %v3436_v53, %v3439_v61  ;;  %v644_v2 = vrot.slane %v643_v51, 1  ;;  %v3460_v5 = vmax.f32 %v337_v33, %v338_v57 }
 0x134   :  { %v522_v46 = vpop.f32.mrf.mxu1  ;;  %v342_v24 = vmax.f32 %v285_v59, %v288_v37  ;;  %v331_v58 = vrot.slane %v330_v39, 2  ;;  %v656_v60 = vrot.slane %v655_v40, 4 }
 0x135   :  { %v592_v50 = vrot.slane %v522_v46, 1  ;;  %v896_v6 = vpop.f32.mrf.mxu0  ;;  %v3458_v46 = vshrl.u32 %v2287_v43, 7  ;;  %v350_v61 = vrot.slane %v349_v62, 4 }
 0x136   :  { %v526_v10 = vpop.f32.mrf.mxu1  ;;  %v343_v45 = vrot.slane %v342_v24, 4  ;;  %v332_v9 = vmax.f32 %v330_v39, %v331_v58  ;;  %v657_v53 = vmax.f32 %v655_v40, %v656_v60 }
 0x137   :  { %v898_v12 = vpop.f32.mrf.mxu0  ;;  %v593_v14 = vsel %vm581_vm0, %v591_v4, %v592_v50  ;;  %v629_v18 = vadd.f32 %v592_v50, %v520_v1  ;;  %v2289_v40 = vsub.s32 0, %v3458_v46 }
 0x138   :  { %v528_v15 = vpop.f32.mrf.mxu1  ;;  %v628_v28 = vadd.f32 %v593_v14, %v516_v56  ;;  %v1088_v35 = vrot.slane %v898_v12, 1  ;;  %v344_v1 = vmax.f32 %v342_v24, %v343_v45  ;;  %v652_v12 = vrot.slane %v651_v30, 1 }
 0x139   :  { %v900_v20 = vpop.f32.mrf.mxu0  ;;  %v594_v29 = vrot.slane %v528_v15, 1  ;;  %v662_v34 = vsel %vm581_vm0, %v629_v18, -inf }
 0x13a   :  { %v530_v25 = vpop.f32.mrf.mxu1  ;;  %v663_v52 = vmax.f32 %v628_v28, %v662_v34  ;;  %v345_v13 = vrot.slane %v344_v1, 2  ;;  %v333_v28 = vrot.slane %v332_v9, 1 }
 0x13b   :  { %v902_v31 = vpop.f32.mrf.mxu0 }
 0x13c   :  { %v532_v36 = vpop.f32.mrf.mxu1  ;;  %v1089_v38 = vrot.slane %v902_v31, 1  ;;  %v664_v37 = vrot.slane %v663_v52, 4  ;;  %v351_v31 = vmax.f32 %v349_v62, %v350_v61 }
 0x13d   :  { %v595_v22 = vrot.slane %v532_v36, 1  ;;  %v906_v42 = vpop.f32.mrf.mxu0  ;;  %v346_v36 = vmax.f32 %v344_v1, %v345_v13 }
 0x13e   :  { %v1090_v47 = vsel %vm581_vm0, %v1088_v35, %v1089_v38  ;;  %v3450_v48 = vadd.f32 %v1089_v38, %v900_v20  ;;  %v536_v49 = vpop.f32.mrf.mxu1  ;;  %v665_v17 = vmax.f32 %v663_v52, %v664_v37  ;;  %v645_v35 = vmax.f32 %v643_v51, %v644_v2 }
 0x13f   :  { %v596_v54 = vsel %vm581_vm0, %v594_v29, %v595_v22  ;;  %v631_v55 = vadd.f32 %v595_v22, %v530_v25  ;;  %v908_v56 = vpop.f32.mrf.mxu0  ;;  %v3453_v19 = vadd.f32 %v1090_v47, %v896_v6  ;;  %v658_v29 = vrot.slane %v657_v53, 2 }
 0x140   :  { %v630_v0 = vadd.f32 %v596_v54, %v526_v10  ;;  %v538_v59 = vpop.f32.mrf.mxu1  ;;  %v1091_v6 = vrot.slane %v908_v56, 1  ;;  %v653_v22 = vmax.f32 %v651_v30, %v652_v12  ;;  %v666_v43 = vrot.slane %v665_v17, 2  ;;  %v3474_v30 = vld [vmem:[#allocation7] sm:$0xf] }
 0x141   :  { %v670_v27 = vsel %vm581_vm0, %v631_v55, -inf  ;;  %v910_v63 = vpop.f32.mrf.mxu0  ;;  %v597_v3 = vrot.slane %v538_v59, 1  ;;  %v334_v56 = vmax.f32 %v332_v9, %v333_v28  ;;  %v659_v57 = vmax.f32 %v657_v53, %v658_v29 }
 0x142   :  { %v540_v32 = vpop.f32.mrf.mxu1  ;;  %v671_v50 = vmax.f32 %v630_v0, %v670_v27  ;;  %v352_v51 = vrot.slane %v351_v31, 2  ;;  %v347_v58 = vrot.slane %v346_v36, 1  ;;  %v667_v1 = vmax.f32 %v665_v17, %v666_v43 }
 0x143   :  { %v912_v4 = vpop.f32.mrf.mxu0  ;;  %v3481_v61 = vrot.slane %v3474_v30, %v2289_v40  ;;  %v660_v12 = vrot.slane %v659_v57, 1 }
 0x144   :  { %v542_v7 = vpop.f32.mrf.mxu1  ;;  %v1092_v8 = vrot.slane %v912_v4, 1  ;;  %v672_v24 = vrot.slane %v671_v50, 4  ;;  %v348_v17 = vmax.f32 %v346_v36, %v347_v58 }
 0x145   :  { %v598_v10 = vrot.slane %v542_v7, 1  ;;  %v916_v11 = vpop.f32.mrf.mxu0  ;;  %v353_v7 = vmax.f32 %v351_v31, %v352_v51 }
 0x146   :  { %v1093_v14 = vsel %vm581_vm0, %v1091_v6, %v1092_v8  ;;  %v3463_v15 = vadd.f32 %v1092_v8, %v910_v63  ;;  %v546_v16 = vpop.f32.mrf.mxu1  ;;  %v673_v47 = vmax.f32 %v671_v50, %v672_v24 }
 0x147   :  { %v599_v18 = vsel %vm581_vm0, %v597_v3, %v598_v10  ;;  %v633_v20 = vadd.f32 %v598_v10, %v540_v32  ;;  %v3466_v21 = vadd.f32 %v1093_v14, %v906_v42  ;;  %v918_v23 = vpop.f32.mrf.mxu0  ;;  %v340_v42 = vrot.slane %v3460_v5, 1 }
 0x148   :  { %v632_v25 = vadd.f32 %v599_v18, %v536_v49  ;;  %v548_v26 = vpop.f32.mrf.mxu1  ;;  %v1094_v52 = vrot.slane %v918_v23, 1  ;;  %v674_v4 = vrot.slane %v673_v47, 2  ;;  %v668_v18 = vrot.slane %v667_v1, 1 }
 0x149   :  { %v678_v33 = vsel %vm581_vm0, %v633_v20, -inf  ;;  %v920_v34 = vpop.f32.mrf.mxu0  ;;  %v600_v44 = vrot.slane %v548_v26, 1  ;;  %v341_v10 = vmax.f32 %v3460_v5, %v340_v42  ;;  %v354_v31 = vrot.slane %v353_v7, 1 }
 0x14a   :  { %v679_v38 = vmax.f32 %v632_v25, %v678_v33  ;;  %v550_v39 = vpop.f32.mrf.mxu1  ;;  %v675_v24 = vmax.f32 %v673_v47, %v674_v4  ;;  %v3151_v47 = vld [vmem:[#allocation8 + $0xf8] sm:$0xff]  }
 0x14b   :  { %v922_v45 = vpop.f32.mrf.mxu0  ;;  %v355_v51 = vmax.f32 %v353_v7, %v354_v31  ;;  %2879 = vmatprep.subr.bf16.mxu0 %v3151_v47 }
 0x14c   :  { %v680_v49 = vrot.slane %v679_v38, 4  ;;  %v552_v54 = vpop.f32.mrf.mxu1  ;;  %v1095_v55 = vrot.slane %v922_v45, 1 }
 0x14d   :  { %v601_v0 = vrot.slane %v552_v54, 1  ;;  %v926_v59 = vpop.f32.mrf.mxu0 }
 0x14e   :  { %v681_v60 = vmax.f32 %v679_v38, %v680_v49  ;;  %v1096_v62 = vsel %vm581_vm0, %v1094_v52, %v1095_v55  ;;  %v3472_v27 = vadd.f32 %v1095_v55, %v920_v34  ;;  %v556_v63 = vpop.f32.mrf.mxu1  ;;  %v661_v38 = vmax.f32 %v659_v57, %v660_v12  ;;  %v3152_v57 = vld [vmem:[#allocation8 + $0xb8] sm:$0xff]  }
 0x14f   :  { %v602_v32 = vsel %vm581_vm0, %v600_v44, %v601_v0  ;;  %v635_v2 = vadd.f32 %v601_v0, %v550_v39  ;;  %v3477_v37 = vadd.f32 %v1096_v62, %v916_v11  ;;  %v928_v3 = vpop.f32.mrf.mxu0  ;;  %v2229_v11 = vsel %vm2228_vm4, %v334_v56, %v3443_v41  ;;  %2880 = vmatpush3.bf16.msra.mxu0 %v3152_v57 }
 0x150   :  { %v634_v50 = vadd.f32 %v602_v32, %v546_v16  ;;  %v558_v6 = vpop.f32.mrf.mxu1  ;;  %v682_v8 = vrot.slane %v681_v60, 2  ;;  %v2245_v16 = vsel %vm2222_vm1, %v653_v22, %v645_v35  ;;  %v1097_v26 = vrot.slane %v928_v3, 1 }
 0x151   :  { %v686_v9 = vsel %vm581_vm0, %v635_v2, -inf  ;;  %v930_v53 = vpop.f32.mrf.mxu0  ;;  %v603_v20 = vrot.slane %v558_v6, 1  ;;  %v2231_v5 = vsel %vm2230_vm5, %v341_v10, %v2229_v11  ;;  %v669_v22 = vmax.f32 %v667_v1, %v668_v18 }
 0x152   :  { %v687_v13 = vmax.f32 %v634_v50, %v686_v9  ;;  %v560_v14 = vpop.f32.mrf.mxu1  ;;  %v683_v33 = vmax.f32 %v681_v60, %v682_v8  ;;  %v2233_v49 = vsel %vm2232_vm6, %v348_v17, %v2231_v5  ;;  %v676_v52 = vrot.slane %v675_v24, 1  ;;  %v3153_v8 = vld [vmem:[#allocation8 + $0xf0] sm:$0xff]  }
 0x153   :  { %v932_v23 = vpop.f32.mrf.mxu0  ;;  %v2246_v1 = vsel %vm2224_vm2, %v661_v38, %v2245_v16  ;;  %v2293_v3 = vsub.s32 1, %v3458_v46  ;;  %v2235_v7 = vsel %vm2234_vm7, %v355_v51, %v2233_v49  ;;  %2881 = vmatprep.subr.bf16.mxu0 %v3153_v8 }
 0x154   :  { %v688_v25 = vrot.slane %v687_v13, 4  ;;  %v562_v28 = vpop.f32.mrf.mxu1  ;;  %v1098_v29 = vrot.slane %v932_v23, 1  ;;  %v684_v0 = vrot.slane %v683_v33, 1  ;;  %v2247_v6 = vsel %vm2226_vm3, %v669_v22, %v2246_v1  ;;  %v3156_v22 = vld [vmem:[#allocation8 + $0xa8] sm:$0xff]  }
 0x155   :  { %v604_v41 = vrot.slane %v562_v28, 1  ;;  %v936_v34 = vpop.f32.mrf.mxu0  ;;  %v677_v9 = vmax.f32 %v675_v24, %v676_v52  ;;  %v3517_v47 = vadd.f32 %v3481_v61, %v2235_v7 }
 0x156   :  { %v689_v39 = vmax.f32 %v687_v13, %v688_v25  ;;  %v1099_v40 = vsel %vm581_vm0, %v1097_v26, %v1098_v29  ;;  %v3489_v35 = vadd.f32 %v1098_v29, %v930_v53  ;;  %v2951_v36 = vpop.f32.mrf.mxu1  ;;  %v3154_v13 = vld [vmem:[#allocation8 + $0xb0] sm:$0xff]  }
 0x157   :  { %v605_v42 = vsel %vm581_vm0, %v603_v20, %v604_v41  ;;  %v637_v43 = vadd.f32 %v604_v41, %v560_v14  ;;  %v3492_v44 = vadd.f32 %v1099_v40, %v926_v59  ;;  %v938_v45 = vpop.f32.mrf.mxu0  ;;  %v1164_v60 = vrot.slane %v2951_v36, 2  ;;  %2882 = vmatpush3.bf16.msra.mxu0 %v3154_v13  ;;  %v3155_v41 = vld [vmem:[#allocation8 + $0xe8] sm:$0xff]  }
 0x158   :  { %v690_v54 = vrot.slane %v689_v39, 2  ;;  %v636_v55 = vadd.f32 %v605_v42, %v556_v63  ;;  %v1009_v56 = vpop.f32.mrf.mxu1  ;;  %v1100_v10 = vrot.slane %v938_v45, 1  ;;  %v685_v14 = vmax.f32 %v683_v33, %v684_v0  ;;  %2883 = vmatprep.subr.bf16.mxu0 %v3155_v41 }
 0x159   :  { %v694_v58 = vsel %vm581_vm0, %v637_v43, -inf  ;;  %v940_v62 = vpop.f32.mrf.mxu0  ;;  %v1161_v4 = vrot.slane %v1009_v56, 2  ;;  %v2248_v45 = vsel %vm2228_vm4, %v677_v9, %v2247_v6 }
 0x15a   :  { %v691_v59 = vmax.f32 %v689_v39, %v690_v54  ;;  %v695_v32 = vmax.f32 %v636_v55, %v694_v58  ;;  %v2952_v2 = vpop.f32.mrf.mxu1  ;;  %v3157_v58 = vld [vmem:[#allocation8 + $0xe0] sm:$0xff]  }
 0x15b   :  { %v1165_v50 = vrot.slane %v2952_v2, 2  ;;  %v942_v63 = vpop.f32.mrf.mxu0  ;;  %2884 = vmatpush3.bf16.msra.mxu0 %v3156_v22 }
 0x15c   :  { %v696_v53 = vrot.slane %v695_v32, 4  ;;  %v1101_v11 = vrot.slane %v942_v63, 1  ;;  %v1012_v12 = vpop.f32.mrf.mxu1  ;;  %v692_v23 = vrot.slane %v691_v59, 1  ;;  %2885 = vmatprep.subr.bf16.mxu0 %v3157_v58 }
 0x15d   :  { %v1166_v16 = vsel %vm1160_vm8, %v1164_v60, %v1165_v50  ;;  %v1204_v17 = vadd.f32 %v1165_v50, %v3463_v15  ;;  %v1162_v18 = vrot.slane %v1012_v12, 2  ;;  %v946_v20 = vpop.f32.mrf.mxu0 }
 0x15e   :  { %v697_v25 = vmax.f32 %v695_v32, %v696_v53  ;;  %v1203_v26 = vadd.f32 %v1166_v16, %v3466_v21  ;;  %v1102_v28 = vsel %vm581_vm0, %v1100_v10, %v1101_v11  ;;  %v2955_v24 = vpop.f32.mrf.mxu1  ;;  %v3507_v5 = vadd.f32 %v1101_v11, %v940_v62  ;;  %v3158_v32 = vld [vmem:[#allocation8 + $0xa0] sm:$0xff]   ;;  %v3160_v10 = vld [vmem:[#allocation8 + $0x98] sm:$0xff]   ;;  %v3161_v16 = vld [vmem:[#allocation8 + $0xd0] sm:$0xff]  }
 0x15f   :  { %v1225_v29 = vsel %vm1160_vm8, %v1204_v17, -inf  ;;  %v3505_v31 = vadd.f32 %v1102_v28, %v936_v34  ;;  %v1163_v33 = vsel %vm1160_vm8, %v1161_v4, %v1162_v18  ;;  %v948_v15 = vpop.f32.mrf.mxu0  ;;  %v1202_v21 = vadd.f32 %v1162_v18, %v3450_v48  ;;  %2886 = vmatpush3.bf16.msra.mxu0 %v3158_v32 }
 0x160   :  { %v698_v38 = vrot.slane %v697_v25, 2  ;;  %v1226_v39 = vmax.f32 %v1203_v26, %v1225_v29  ;;  %v1201_v40 = vadd.f32 %v1163_v33, %v3453_v19  ;;  %v1025_v36 = vpop.f32.mrf.mxu1  ;;  %v1170_v42 = vrot.slane %v2955_v24, 2 }
 0x161   :  { %v950_v43 = vpop.f32.mrf.mxu0  ;;  %v3514_v34 = vrot.slane %v3474_v30, %v2293_v3  ;;  %v1217_v54 = vsel %vm1160_vm8, %v1202_v21, -inf  ;;  %v2249_v48 = vsel %vm2230_vm5, %v685_v14, %v2248_v45  ;;  %v693_v55 = vmax.f32 %v691_v59, %v692_v23  ;;  %v3159_v59 = vld [vmem:[#allocation8 + $0xd8] sm:$0xff]  }
 0x162   :  { %v699_v49 = vmax.f32 %v697_v25, %v698_v38  ;;  %v1227_v52 = vrot.slane %v1226_v39, 4  ;;  %v2956_v19 = vpop.f32.mrf.mxu1  ;;  %v1218_v56 = vmax.f32 %v1201_v40, %v1217_v54  ;;  %v1167_v57 = vrot.slane %v1025_v36, 2  ;;  %2887 = vmatprep.subr.bf16.mxu0 %v3159_v59  ;;  %v3162_v40 = vld [vmem:[#allocation8 + $0x90] sm:$0xff]  }
 0x163   :  { %v1171_v51 = vrot.slane %v2956_v19, 2  ;;  %v952_v0 = vpop.f32.mrf.mxu0  ;;  %v1103_v62 = vrot.slane %v948_v15, 1  ;;  %v2250_v33 = vsel %vm2232_vm6, %v693_v55, %v2249_v48  ;;  %2888 = vmatpush3.bf16.msra.mxu0 %v3160_v10 }
 0x164   :  { %v700_v30 = vrot.slane %v699_v49, 1  ;;  %v1228_v60 = vmax.f32 %v1226_v39, %v1227_v52  ;;  %v1104_v61 = vrot.slane %v952_v0, 1  ;;  %v1028_v1 = vpop.f32.mrf.mxu1  ;;  %v1219_v2 = vrot.slane %v1218_v56, 4  ;;  %2889 = vmatprep.subr.bf16.mxu0 %v3161_v16 }
 0x165   :  { %v1172_v3 = vsel %vm1160_vm8, %v1170_v42, %v1171_v51  ;;  %v1208_v4 = vadd.f32 %v1171_v51, %v3489_v35  ;;  %v1168_v50 = vrot.slane %v1028_v1, 2  ;;  %v956_v63 = vpop.f32.mrf.mxu0  ;;  %v3163_v42 = vld [vmem:[#allocation8 + $0xc8] sm:$0xff]  }
 0x166   :  { %v1229_v6 = vrot.slane %v1228_v60, 2  ;;  %v1207_v7 = vadd.f32 %v1172_v3, %v3492_v44  ;;  %v1105_v8 = vsel %vm581_vm0, %v1103_v62, %v1104_v61  ;;  %v1139_v9 = vadd.f32 %v1104_v61, %v950_v43  ;;  %v2959_v53 = vpop.f32.mrf.mxu1  ;;  %v3164_v62 = vld [vmem:[#allocation8 + $0x88] sm:$0xff]  }
 0x167   :  { %v1220_v11 = vmax.f32 %v1218_v56, %v1219_v2  ;;  %v1241_v12 = vsel %vm1160_vm8, %v1208_v4, -inf  ;;  %v1138_v13 = vadd.f32 %v1105_v8, %v946_v20  ;;  %v1169_v14 = vsel %vm1160_vm8, %v1167_v57, %v1168_v50  ;;  %v958_v35 = vpop.f32.mrf.mxu0  ;;  %2890 = vmatpush3.bf16.msra.mxu0 %v3162_v40  ;;  %v3165_v4 = vld [vmem:[#allocation8 + $0xc0] sm:$0xff]  }
 0x168   :  { %v1230_v17 = vmax.f32 %v1228_v60, %v1229_v6  ;;  %v1242_v18 = vmax.f32 %v1207_v7, %v1241_v12  ;;  %v1205_v23 = vadd.f32 %v1169_v14, %v3477_v37  ;;  %v1206_v44 = vadd.f32 %v1168_v50, %v3472_v27  ;;  %v1041_v25 = vpop.f32.mrf.mxu1  ;;  %2891 = vmatprep.subr.bf16.mxu0 %v3163_v42 }
 0x169   :  { %v1221_v26 = vrot.slane %v1220_v11, 2  ;;  %v1176_v28 = vrot.slane %v2959_v53, 2  ;;  %v1106_v24 = vrot.slane %v958_v35, 1  ;;  %v960_v29 = vpop.f32.mrf.mxu0  ;;  %v701_v39 = vmax.f32 %v699_v49, %v700_v30 }
 0x16a   :  { %v1231_v15 = vrot.slane %v1230_v17, 1  ;;  %v1243_v20 = vrot.slane %v1242_v18, 4  ;;  %v1233_v41 = vsel %vm1160_vm8, %v1206_v44, -inf  ;;  %v2960_v38 = vpop.f32.mrf.mxu1  ;;  %v1173_v37 = vrot.slane %v1041_v25, 2 }
 0x16b   :  { %v1222_v21 = vmax.f32 %v1220_v11, %v1221_v26  ;;  %v1234_v36 = vmax.f32 %v1205_v23, %v1233_v41  ;;  %v1177_v22 = vrot.slane %v2960_v38, 2  ;;  %v962_v27 = vpop.f32.mrf.mxu0  ;;  %v2251_v19 = vsel %vm2234_vm7, %v701_v39, %v2250_v33  ;;  %2892 = vmatpush3.bf16.msra.mxu0 %v3164_v62 }
 0x16c   :  { %v1232_v43 = vmax.f32 %v1230_v17, %v1231_v15  ;;  %v1244_v45 = vmax.f32 %v1242_v18, %v1243_v20  ;;  %v1107_v52 = vrot.slane %v962_v27, 1  ;;  %v1044_v54 = vpop.f32.mrf.mxu1  ;;  %v2311_v8 = vmax.f32 %v3517_v47, 0.0  ;;  %v3166_v17 = vld [vmem:[#allocation8 + $0x80] sm:$0xff]   ;;  %2893 = vmatprep.subr.bf16.mxu0 %v3165_v4 }
 0x16d   :  { %v1223_v48 = vrot.slane %v1222_v21, 1  ;;  %v1235_v55 = vrot.slane %v1234_v36, 4  ;;  %v1178_v56 = vsel %vm1160_vm8, %v1176_v28, %v1177_v22  ;;  %v1212_v49 = vadd.f32 %v1177_v22, %v1139_v9  ;;  %v966_v57 = vpop.f32.mrf.mxu0 }
 0x16e   :  { %v1245_v51 = vrot.slane %v1244_v45, 2  ;;  %v1211_v0 = vadd.f32 %v1178_v56, %v1138_v13  ;;  %v1108_v58 = vsel %vm581_vm0, %v1106_v24, %v1107_v52  ;;  %v1141_v30 = vadd.f32 %v1107_v52, %v960_v29  ;;  %v2963_v60 = vpop.f32.mrf.mxu1 }
 0x16f   :  { %v1224_v61 = vmax.f32 %v1222_v21, %v1223_v48  ;;  %v1236_v1 = vmax.f32 %v1234_v36, %v1235_v55  ;;  %v1257_v32 = vsel %vm1160_vm8, %v1212_v49, -inf  ;;  %v1140_v2 = vadd.f32 %v1108_v58, %v956_v63  ;;  %v968_v3 = vpop.f32.mrf.mxu0  ;;  %2894 = vmatpush3.bf16.msra.mxu0 %v3166_v17 }
 0x170   :  { %v1246_v50 = vmax.f32 %v1244_v45, %v1245_v51  ;;  %v1258_v59 = vmax.f32 %v1211_v0, %v1257_v32  ;;  %v1174_v6 = vrot.slane %v1044_v54, 2  ;;  %v1057_v7 = vpop.f32.mrf.mxu1  ;;  %v1182_v10 = vrot.slane %v2963_v60, 2 }
 0x171   :  { %v2261_v9 = vsel %vm2222_vm1, %v1232_v43, %v1224_v61  ;;  %v1237_v53 = vrot.slane %v1236_v1, 2  ;;  %v2308_v11 = vadd.f32 %v3514_v34, %v2251_v19  ;;  %v970_v12 = vpop.f32.mrf.mxu0  ;;  %v1109_v35 = vrot.slane %v968_v3, 1 }
 0x172   :  { %v1259_v13 = vrot.slane %v1258_v59, 4  ;;  %v1175_v14 = vsel %vm1160_vm8, %v1173_v37, %v1174_v6  ;;  %v1210_v63 = vadd.f32 %v1174_v6, %v3507_v5  ;;  %v2964_v16 = vpop.f32.mrf.mxu1  ;;  %v1247_v18 = vrot.slane %v1246_v50, 1 }
 0x173   :  { %v1238_v23 = vmax.f32 %v1236_v1, %v1237_v53  ;;  %v1209_v47 = vadd.f32 %v1175_v14, %v3505_v31  ;;  %v2312_v44 = vmax.f32 %v2308_v11, 0.0  ;;  %v972_v25 = vpop.f32.mrf.mxu0  ;;  %v1179_v28 = vrot.slane %v1057_v7, 2 }
 0x174   :  { %v1260_v26 = vmax.f32 %v1258_v59, %v1259_v13  ;;  %v1249_v34 = vsel %vm1160_vm8, %v1210_v63, -inf  ;;  %v1183_v24 = vrot.slane %v2964_v16, 2  ;;  %v1060_v29 = vpop.f32.mrf.mxu1  ;;  %v1110_v20 = vrot.slane %v972_v25, 1 }
 0x175   :  { %v1239_v33 = vrot.slane %v1238_v23, 1  ;;  %v1250_v15 = vmax.f32 %v1209_v47, %v1249_v34  ;;  %v2316_v5 = vpack.c.bf16 %v2312_v44, %v2312_v44  ;;  %v1571_v41 = vpop.f32.mrf.mxu0  ;;  %v2315_v39 = vpack.c.bf16 %v2311_v8, %v2311_v8 }
 0x176   :  { %v1261_v38 = vrot.slane %v1260_v26, 2  ;;  %v1184_v40 = vsel %vm1160_vm8, %v1182_v10, %v1183_v24  ;;  %v1180_v21 = vrot.slane %v1060_v29, 2  ;;  %v3543_v31 = vpop.f32.mrf.mxu1  ;;  %v1111_v22 = vsel %vm581_vm0, %v1109_v35, %v1110_v20 }
 0x177   :  { %v1240_v36 = vmax.f32 %v1238_v23, %v1239_v33  ;;  %v1251_v37 = vrot.slane %v1250_v15, 4  ;;  %2614 = vmatprep.mubr.bf16.mxu1 %v2316_v5  ;;  %v1143_v27 = vadd.f32 %v1110_v20, %v970_v12  ;;  %v1573_v42 = vpop.f32.mrf.mxu0  ;;  %v1248_v43 = vmax.f32 %v1246_v50, %v1247_v18 }
 0x178   :  { %2615 = vmatmul.mubr.bf16.vlgmr.msra.gmra.mxu1 %v2315_v39  ;;  %v1142_v45 = vadd.f32 %v1111_v22, %v966_v57  ;;  %v1181_v52 = vsel %vm1160_vm8, %v1179_v28, %v1180_v21  ;;  %v1214_v54 = vadd.f32 %v1180_v21, %v1141_v30  ;;  %v3547_v19 = vpop.f32.mrf.mxu1  ;;  %v1262_v0 = vmax.f32 %v1260_v26, %v1261_v38 }
 0x179   :  { %v2262_v48 = vsel %vm2224_vm2, %v1240_v36, %v2261_v9  ;;  %v1252_v55 = vmax.f32 %v1250_v15, %v1251_v37  ;;  %v1216_v56 = vadd.f32 %v1183_v24, %v1143_v27  ;;  %v1213_v49 = vadd.f32 %v1181_v52, %v1140_v2  ;;  %v1575_v51 = vpop.f32.mrf.mxu0 }
 0x17a   :  { %v2263_v58 = vsel %vm2226_vm3, %v1248_v43, %v2262_v48  ;;  %v1215_v60 = vadd.f32 %v1184_v40, %v1142_v45  ;;  %v1265_v62 = vsel %vm1160_vm8, %v1214_v54, -inf  ;;  %v3552_v61 = vpop.f32.mrf.mxu1  ;;  %v1876_v4 = vrot.slane %v1573_v42, 1 }
 0x17b   :  { %v1253_v57 = vrot.slane %v1252_v55, 2  ;;  %v1273_v1 = vsel %vm1160_vm8, %v1216_v56, -inf  ;;  %v1266_v30 = vmax.f32 %v1213_v49, %v1265_v62  ;;  %v1577_v32 = vpop.f32.mrf.mxu0  ;;  %v1263_v8 = vrot.slane %v1262_v0, 1 }
 0x17c   :  { %v1274_v3 = vmax.f32 %v1215_v60, %v1273_v1  ;;  %v1877_v50 = vrot.slane %v1577_v32, 1  ;;  %v3555_v59 = vpop.f32.mrf.mxu1 }
 0x17d   :  { %v1254_v2 = vmax.f32 %v1252_v55, %v1253_v57  ;;  %v1267_v6 = vrot.slane %v1266_v30, 4  ;;  %v1581_v7 = vpop.f32.mrf.mxu0  ;;  %v1264_v47 = vmax.f32 %v1262_v0, %v1263_v8 }
 0x17e   :  { %v1275_v9 = vrot.slane %v1274_v3, 4  ;;  %v1878_v53 = vsel %vm581_vm0, %v1876_v4, %v1877_v50  ;;  %v3558_v10 = vadd.f32 %v1877_v50, %v1575_v51  ;;  %v3560_v11 = vpop.f32.mrf.mxu1 }
 0x17f   :  { %v1255_v12 = vrot.slane %v1254_v2, 1  ;;  %v1268_v13 = vmax.f32 %v1266_v30, %v1267_v6  ;;  %v3562_v14 = vadd.f32 %v1878_v53, %v1571_v41  ;;  %v1583_v63 = vpop.f32.mrf.mxu0 }
 0x180   :  { %v1276_v35 = vmax.f32 %v1274_v3, %v1275_v9  ;;  %v3564_v16 = vpop.f32.mrf.mxu1  ;;  %v1879_v33 = vrot.slane %v1583_v63, 1 }
 0x181   :  { %v1256_v17 = vmax.f32 %v1254_v2, %v1255_v12  ;;  %v1269_v18 = vrot.slane %v1268_v13, 2  ;;  %v1585_v23 = vpop.f32.mrf.mxu0 }
 0x182   :  { %v1277_v44 = vrot.slane %v1276_v35, 2  ;;  %v3566_v25 = vpop.f32.mrf.mxu1 }
 0x183   :  { %v2264_v26 = vsel %vm2228_vm4, %v1256_v17, %v2263_v58  ;;  %v1270_v34 = vmax.f32 %v1268_v13, %v1269_v18  ;;  %v1587_v28 = vpop.f32.mrf.mxu0  ;;  %v1948_v17 = vrot.slane %v3543_v31, 2  ;;  %v1949_v18 = vrot.slane %v3552_v61, 2 }
 0x184   :  { %v1278_v24 = vmax.f32 %v1276_v35, %v1277_v44  ;;  %v2265_v29 = vsel %vm2230_vm5, %v1264_v47, %v2264_v26  ;;  %v1880_v15 = vrot.slane %v1587_v28, 1  ;;  %v3570_v5 = vpop.f32.mrf.mxu1 }
 0x185   :  { %v1271_v20 = vrot.slane %v1270_v34, 1  ;;  %v1591_v41 = vpop.f32.mrf.mxu0  ;;  %v1950_v28 = vsel %vm1160_vm8, %v1948_v17, %v1949_v18  ;;  %v1989_v31 = vadd.f32 %v1949_v18, %v3558_v10 }
 0x186   :  { %v1279_v38 = vrot.slane %v1278_v24, 1  ;;  %v1881_v39 = vsel %vm581_vm0, %v1879_v33, %v1880_v15  ;;  %v3573_v40 = vadd.f32 %v1880_v15, %v1585_v23  ;;  %v3575_v21 = vpop.f32.mrf.mxu1  ;;  %v1988_v33 = vadd.f32 %v1950_v28, %v3562_v14 }
 0x187   :  { %v1272_v36 = vmax.f32 %v1270_v34, %v1271_v20  ;;  %v3577_v37 = vadd.f32 %v1881_v39, %v1581_v7  ;;  %v1593_v22 = vpop.f32.mrf.mxu0  ;;  %v2021_v34 = vrot.slane %v3547_v19, 3  ;;  %v1951_v15 = vrot.slane %v3560_v11, 2 }
 0x188   :  { %v1280_v27 = vmax.f32 %v1278_v24, %v1279_v38  ;;  %v3579_v42 = vpop.f32.mrf.mxu1  ;;  %v1882_v55 = vrot.slane %v1593_v22, 1  ;;  %v2022_v24 = vrot.slane %v3555_v59, 3  ;;  %v1952_v20 = vrot.slane %v3566_v25, 2 }
 0x189   :  { %v2266_v43 = vsel %vm2232_vm6, %v1272_v36, %v2265_v29  ;;  %v3582_v45 = vpop.f32.mrf.mxu0  ;;  %v2024_v59 = vrot.slane %v3564_v16, 3  ;;  %v2025_v36 = vrot.slane %v3570_v5, 3  ;;  %v1954_v25 = vrot.slane %v3575_v21, 2 }
 0x18a   :  { %v3584_v52 = vpop.f32.mrf.mxu1  ;;  %v3587_v54 = vsel %vm2234_vm7, %v1280_v27, %v2266_v43  ;;  %v2023_v19 = vsel %vm2020_vm9, %v2021_v34, %v2022_v24  ;;  %v3659_v10 = vadd.f32 %v2022_v24, %v1989_v31  ;;  %v1953_v11 = vsel %vm1160_vm8, %v1951_v15, %v1952_v20 }
 0x18b   :  { %v3589_v48 = vpop.f32.mrf.mxu0  ;;  %v3663_v14 = vadd.f32 %v2023_v19, %v1988_v33  ;;  %v1955_v43 = vrot.slane %v3584_v52, 2  ;;  %v1991_v17 = vadd.f32 %v1952_v20, %v3573_v40  ;;  %v2026_v18 = vsel %vm2020_vm9, %v2024_v59, %v2025_v36 }
 0x18c   :  { %v1883_v56 = vrot.slane %v3589_v48, 1  ;;  %v3592_v49 = vpop.f32.mrf.mxu1  ;;  %v2027_v21 = vrot.slane %v3579_v42, 3  ;;  %v1990_v48 = vadd.f32 %v1953_v11, %v3577_v37 }
 0x18d   :  { %v3594_v51 = vpop.f32.mrf.mxu0  ;;  %v2028_v52 = vrot.slane %v3592_v49, 3  ;;  %v1956_v24 = vsel %vm1160_vm8, %v1954_v25, %v1955_v43 }
 0x18e   :  { %v1884_v0 = vsel %vm581_vm0, %v1882_v55, %v1883_v56  ;;  %v3599_v58 = vpop.f32.mrf.mxu1 }
 0x18f   :  { %v3601_v60 = vadd.f32 %v1884_v0, %v1591_v41  ;;  %v1603_v62 = vpop.f32.mrf.mxu0  ;;  %v1957_v0 = vrot.slane %v3599_v58, 2  ;;  %v1921_v58 = vadd.f32 %v1883_v56, %v3582_v45 }
 0x190   :  { %v3603_v57 = vpop.f32.mrf.mxu1  ;;  %v1885_v22 = vrot.slane %v1603_v62, 1 }
 0x191   :  { %v1605_v1 = vpop.f32.mrf.mxu0  ;;  %v2030_v28 = vrot.slane %v3603_v57, 3  ;;  %v1992_v33 = vadd.f32 %v1956_v24, %v3601_v60  ;;  %v1993_v15 = vadd.f32 %v1955_v43, %v1921_v58  ;;  %v2064_v43 = vadd.f32 %v2025_v36, %v1991_v17 }
 0x192   :  { %v3605_v30 = vpop.f32.mrf.mxu1 }
 0x193   :  { %v1607_v32 = vpop.f32.mrf.mxu0  ;;  %v1958_v5 = vrot.slane %v3605_v30, 2 }
 0x194   :  { %v3607_v3 = vpop.f32.mrf.mxu1  ;;  %v1886_v38 = vrot.slane %v1607_v32, 1 }
 0x195   :  { %v3609_v4 = vpop.f32.mrf.mxu0  ;;  %v2031_v30 = vrot.slane %v3607_v3, 3  ;;  %v1959_v45 = vsel %vm1160_vm8, %v1957_v0, %v1958_v5  ;;  %v2029_v3 = vsel %vm2020_vm9, %v2027_v21, %v2028_v52 }
 0x196   :  { %v3611_v50 = vpop.f32.mrf.mxu1  ;;  %v1887_v16 = vsel %vm581_vm0, %v1885_v22, %v1886_v38  ;;  %v1923_v34 = vadd.f32 %v1886_v38, %v1605_v1 }
 0x197   :  { %v3613_v2 = vpop.f32.mrf.mxu0  ;;  %v1922_v40 = vadd.f32 %v1887_v16, %v3594_v51  ;;  %v1960_v51 = vrot.slane %v3611_v50, 2  ;;  %v2032_v20 = vsel %vm2020_vm9, %v2030_v28, %v2031_v30 }
 0x198   :  { %v3615_v6 = vpop.f32.mrf.mxu1  ;;  %v1888_v31 = vrot.slane %v3613_v2, 1  ;;  %v1995_v37 = vadd.f32 %v1958_v5, %v1923_v34  ;;  %v2063_v5 = vadd.f32 %v2026_v18, %v1990_v48 }
 0x199   :  { %v1615_v7 = vpop.f32.mrf.mxu0 }
 0x19a   :  { %v3617_v8 = vpop.f32.mrf.mxu1 }
 0x19b   :  { %v3619_v9 = vpop.f32.mrf.mxu0  ;;  %v1961_v57 = vrot.slane %v3617_v8, 2  ;;  %v1994_v8 = vadd.f32 %v1959_v45, %v1922_v40 }
 0x19c   :  { %v3621_v53 = vpop.f32.mrf.mxu1  ;;  %v1889_v62 = vrot.slane %v3619_v9, 1 }
 0x19d   :  { %v3623_v12 = vpop.f32.mrf.mxu0  ;;  %v2034_v11 = vrot.slane %v3621_v53, 3  ;;  %v1962_v0 = vsel %vm1160_vm8, %v1960_v51, %v1961_v57  ;;  %v3723_v58 = vadd.f32 %v2032_v20, %v1994_v8  ;;  %v2068_v53 = vadd.f32 %v2031_v30, %v1995_v37 }
 0x19e   :  { %v3625_v13 = vpop.f32.mrf.mxu1  ;;  %v1925_v56 = vadd.f32 %v1889_v62, %v1615_v7  ;;  %v1890_v2 = vsel %vm581_vm0, %v1888_v31, %v1889_v62  ;;  %v3717_v62 = vadd.f32 %v2028_v52, %v1993_v15 }
 0x19f   :  { %v3627_v63 = vpop.f32.mrf.mxu0  ;;  %v1963_v19 = vrot.slane %v3625_v13, 2  ;;  %v1924_v22 = vadd.f32 %v1890_v2, %v3609_v4 }
 0x1a0   :  { %v3629_v35 = vpop.f32.mrf.mxu1  ;;  %v1997_v60 = vadd.f32 %v1961_v57, %v1925_v56 }
 0x1a1   :  { %v3633_v23 = vpop.f32.mrf.mxu0  ;;  %v2036_v16 = vrot.slane %v3629_v35, 3  ;;  %v1996_v35 = vadd.f32 %v1962_v0, %v1924_v22 }
 0x1a2   :  { %v3635_v47 = vpop.f32.mrf.mxu1  ;;  %v3729_v18 = vadd.f32 %v2034_v11, %v1997_v60 }
 0x1a3   :  { %v3637_v44 = vpop.f32.mrf.mxu0  ;;  %v1964_v59 = vrot.slane %v3635_v47, 2 }
 0x1a4   :  { %v3639_v26 = vpop.f32.mrf.mxu1  ;;  %v1892_v42 = vrot.slane %v3637_v44, 1  ;;  %v1891_v44 = vrot.slane %v3627_v63, 1  ;;  %v2033_v63 = vrot.slane %v3615_v6, 3  ;;  %v3721_v6 = vadd.f32 %v2029_v3, %v1992_v33 }
 0x1a5   :  { %v3644_v29 = vpop.f32.mrf.mxu0  ;;  %v2037_v13 = vrot.slane %v3639_v26, 3  ;;  %v1965_v36 = vsel %vm1160_vm8, %v1963_v19, %v1964_v59 }
 0x1a6   :  { %v3652_v41 = vpop.f32.mrf.mxu1  ;;  %v1893_v38 = vsel %vm581_vm0, %v1891_v44, %v1892_v42  ;;  %v1927_v4 = vadd.f32 %v1892_v42, %v3633_v23  ;;  %v2035_v26 = vsel %vm2020_vm9, %v2033_v63, %v2034_v11 }
 0x1a7   :  { %v3647_v61 = vpop.f32.mrf.mxu0  ;;  %v1926_v47 = vadd.f32 %v1893_v38, %v3623_v12  ;;  %v2038_v23 = vsel %vm2020_vm9, %v2036_v16, %v2037_v13  ;;  %v1966_v34 = vrot.slane %v3652_v41, 2  ;;  %v3746_v20 = vadd.f32 %v2035_v26, %v1996_v35 }
 0x1a8   :  { %v3668_v55 = vpop.f32.mrf.mxu1  ;;  %v1999_v30 = vadd.f32 %v1964_v59, %v1927_v4  ;;  %v1894_v31 = vrot.slane %v3647_v61, 1 }
 0x1a9   :  { %v3655_v39 = vpop.f32.mrf.mxu0  ;;  %v1998_v40 = vadd.f32 %v1965_v36, %v1926_v47  ;;  %v2039_v41 = vrot.slane %v3668_v55, 3 }
 0x1aa   :  { %v3691_v49 = vpop.f32.mrf.mxu1  ;;  %v3748_v8 = vadd.f32 %v2037_v13, %v1999_v30 }
 0x1ab   :  { %v3661_v27 = vpop.f32.mrf.mxu0  ;;  %v1967_v42 = vrot.slane %v3691_v49, 2  ;;  %v3751_v59 = vadd.f32 %v2038_v23, %v1998_v40 }
 0x1ac   :  { %v3709_v50 = vpop.f32.mrf.mxu1  ;;  %v1895_v52 = vrot.slane %v3661_v27, 1 }
 0x1ad   :  { %v3674_v32 = vpop.f32.mrf.mxu0  ;;  %v2040_v2 = vrot.slane %v3709_v50, 3 }
 0x1ae   :  { %v3726_v17 = vpop.f32.mrf.mxu1  ;;  %v1896_v51 = vsel %vm581_vm0, %v1894_v31, %v1895_v52  ;;  %v1929_v61 = vadd.f32 %v1895_v52, %v3655_v39  ;;  %v3757_v39 = vsel %vm1160_vm8, %v1966_v34, %v1967_v42 }
 0x1af   :  { %v3685_v9 = vpop.f32.mrf.mxu0  ;;  %v3754_v22 = vadd.f32 %v1896_v51, %v3644_v29  ;;  %v1969_v29 = vrot.slane %v3726_v17, 2 }
 0x1b0   :  { %v3736_v45 = vpop.f32.mrf.mxu1  ;;  %v3766_v0 = vadd.f32 %v1967_v42, %v1929_v61 }
 0x1b1   :  { %v3696_v1 = vpop.f32.mrf.mxu0 }
 0x1b2   :  { %v1758_v63 = vpop.f32.mrf.mxu1 }
 0x1b3   :  { %v3704_v7 = vpop.f32.mrf.mxu0  ;;  %v1970_v47 = vrot.slane %v1758_v63, 2 }
 0x1b4   :  { %v1898_v11 = vrot.slane %v3704_v7, 1  ;;  %v1760_v23 = vpop.f32.mrf.mxu1 }
 0x1b5   :  { %v2983_v25 = vpop.f32.mrf.mxu0 }
 0x1b6   :  { %v2097_v28 = vrot.slane %v2983_v25, 4  ;;  %v1931_v40 = vadd.f32 %v1898_v11, %v3696_v1 }
 0x1b7   :  { %v1797_v21 = vpop.f32.mrf.mxu0 }
 0x1b8   :  { %v2094_v56 = vrot.slane %v1797_v21, 4 }
 0x1b9   :  { %v2984_v12 = vpop.f32.mrf.mxu0 }
 0x1ba   :  { %v2098_v24 = vrot.slane %v2984_v12, 4 }
 0x1bb   :  { %v1800_v48 = vpop.f32.mrf.mxu0 }
 0x1bc   :  { %v2099_v57 = vsel %vm2093_vm10, %v2097_v28, %v2098_v24  ;;  %v2137_v27 = vadd.f32 %v2098_v24, %v2064_v43  ;;  %v2095_v3 = vrot.slane %v1800_v48, 4 }
 0x1bd   :  { %v2136_v44 = vadd.f32 %v2099_v57, %v2063_v5  ;;  %v2987_v33 = vpop.f32.mrf.mxu0  ;;  %v1897_v5 = vrot.slane %v3685_v9, 1 }
 0x1be   :  { %v2158_v49 = vsel %vm2093_vm10, %v2137_v27, -inf  ;;  %v2096_v15 = vsel %vm2093_vm10, %v2094_v56, %v2095_v3  ;;  %v2135_v37 = vadd.f32 %v2095_v3, %v3659_v10  ;;  %v3763_v10 = vsel %vm2020_vm9, %v2039_v41, %v2040_v2 }
 0x1bf   :  { %v2159_v19 = vmax.f32 %v2136_v44, %v2158_v49  ;;  %v2134_v38 = vadd.f32 %v2096_v15, %v3663_v14  ;;  %v1813_v55 = vpop.f32.mrf.mxu0  ;;  %v2103_v16 = vrot.slane %v2987_v33, 4  ;;  %v1899_v12 = vsel %vm581_vm0, %v1897_v5, %v1898_v11 }
 0x1c0   :  { %v2150_v60 = vsel %vm2093_vm10, %v2135_v37, -inf  ;;  %v2100_v35 = vrot.slane %v1813_v55, 4  ;;  %v2042_v27 = vrot.slane %v3736_v45, 3  ;;  %v1971_v3 = vsel %vm1160_vm8, %v1969_v29, %v1970_v47 }
 0x1c1   :  { %v2160_v14 = vrot.slane %v2159_v19, 4  ;;  %v2151_v25 = vmax.f32 %v2134_v38, %v2150_v60  ;;  %v2988_v43 = vpop.f32.mrf.mxu0  ;;  %v2003_v49 = vadd.f32 %v1970_v47, %v1931_v40 }
 0x1c2   :  { %v2104_v13 = vrot.slane %v2988_v43, 4 }
 0x1c3   :  { %v2161_v4 = vmax.f32 %v2159_v19, %v2160_v14  ;;  %v2152_v21 = vrot.slane %v2151_v25, 4  ;;  %v1816_v36 = vpop.f32.mrf.mxu0 }
 0x1c4   :  { %v2105_v26 = vsel %vm2093_vm10, %v2103_v16, %v2104_v13  ;;  %v2141_v52 = vadd.f32 %v2104_v13, %v2068_v53  ;;  %v2101_v7 = vrot.slane %v1816_v36, 4 }
 0x1c5   :  { %v2162_v34 = vrot.slane %v2161_v4, 2  ;;  %v2153_v28 = vmax.f32 %v2151_v25, %v2152_v21  ;;  %v2140_v17 = vadd.f32 %v2105_v26, %v3723_v58  ;;  %v2991_v24 = vpop.f32.mrf.mxu0  ;;  %v2043_v58 = vrot.slane %v1760_v23, 3 }
 0x1c6   :  { %v2174_v9 = vsel %vm2093_vm10, %v2141_v52, -inf  ;;  %v2102_v30 = vsel %vm2093_vm10, %v2100_v35, %v2101_v7  ;;  %v2139_v31 = vadd.f32 %v2101_v7, %v3717_v62  ;;  %v1930_v62 = vadd.f32 %v1899_v12, %v3674_v32 }
 0x1c7   :  { %v2163_v42 = vmax.f32 %v2161_v4, %v2162_v34  ;;  %v2154_v48 = vrot.slane %v2153_v28, 2  ;;  %v2175_v53 = vmax.f32 %v2140_v17, %v2174_v9  ;;  %v2138_v56 = vadd.f32 %v2102_v30, %v3721_v6  ;;  %v1829_v57 = vpop.f32.mrf.mxu0 }
 0x1c8   :  { %v2166_v51 = vsel %vm2093_vm10, %v2139_v31, -inf  ;;  %v2109_v15 = vrot.slane %v2991_v24, 4  ;;  %v2106_v55 = vrot.slane %v1829_v57, 4  ;;  %v2002_v13 = vadd.f32 %v1971_v3, %v1930_v62 }
 0x1c9   :  { %v2164_v1 = vrot.slane %v2163_v42, 1  ;;  %v2155_v41 = vmax.f32 %v2153_v28, %v2154_v48  ;;  %v2176_v44 = vrot.slane %v2175_v53, 4  ;;  %v2167_v33 = vmax.f32 %v2138_v56, %v2166_v51  ;;  %v2992_v61 = vpop.f32.mrf.mxu0 }
 0x1ca   :  { %v2110_v37 = vrot.slane %v2992_v61, 4  ;;  %v2000_v52 = vadd.f32 %v3757_v39, %v3754_v22  ;;  %v2044_v7 = vsel %vm2020_vm9, %v2042_v27, %v2043_v58  ;;  %v2074_v23 = vadd.f32 %v2040_v2, %v3766_v0 }
 0x1cb   :  { %v2156_v19 = vrot.slane %v2155_v41, 1  ;;  %v2177_v6 = vmax.f32 %v2175_v53, %v2176_v44  ;;  %v2168_v38 = vrot.slane %v2167_v33, 4  ;;  %v1832_v45 = vpop.f32.mrf.mxu0  ;;  %v2165_v63 = vmax.f32 %v2163_v42, %v2164_v1 }
 0x1cc   :  { %v2111_v60 = vsel %vm2093_vm10, %v2109_v15, %v2110_v37  ;;  %v2145_v11 = vadd.f32 %v2110_v37, %v3748_v8  ;;  %v2107_v14 = vrot.slane %v1832_v45, 4  ;;  %v2076_v24 = vadd.f32 %v2043_v58, %v2003_v49 }
 0x1cd   :  { %v2157_v25 = vmax.f32 %v2155_v41, %v2156_v19  ;;  %v2178_v43 = vrot.slane %v2177_v6, 2  ;;  %v2169_v29 = vmax.f32 %v2167_v33, %v2168_v38  ;;  %v2144_v16 = vadd.f32 %v2111_v60, %v3751_v59  ;;  %v2995_v32 = vpop.f32.mrf.mxu0 }
 0x1ce   :  { %v2190_v5 = vsel %vm2093_vm10, %v2145_v11, -inf  ;;  %v2108_v47 = vsel %vm2093_vm10, %v2106_v55, %v2107_v14  ;;  %v2143_v4 = vadd.f32 %v2107_v14, %v3729_v18  ;;  %v2115_v9 = vrot.slane %v2995_v32, 4 }
 0x1cf   :  { %v2277_v21 = vsel %vm2222_vm1, %v2165_v63, %v2157_v25  ;;  %v2179_v36 = vmax.f32 %v2177_v6, %v2178_v43  ;;  %v2170_v35 = vrot.slane %v2169_v29, 2  ;;  %v2191_v26 = vmax.f32 %v2144_v16, %v2190_v5  ;;  %v1845_v8 = vpop.f32.mrf.mxu0  ;;  %v3167_v5 = vld [vmem:[#allocation7] sm:$0xf] }
 0x1d0   :  { %v2142_v59 = vadd.f32 %v2108_v47, %v3746_v20  ;;  %v2182_v12 = vsel %vm2093_vm10, %v2143_v4, -inf  ;;  %v2075_v31 = vadd.f32 %v2044_v7, %v2002_v13  ;;  %v2112_v42 = vrot.slane %v1845_v8, 4 }
 0x1d1   :  { %v2180_v18 = vrot.slane %v2179_v36, 1  ;;  %v2171_v34 = vmax.f32 %v2169_v29, %v2170_v35  ;;  %v2192_v28 = vrot.slane %v2191_v26, 4  ;;  %v2996_v17 = vpop.f32.mrf.mxu0  ;;  %v2073_v50 = vadd.f32 %v3763_v10, %v2000_v52 }
 0x1d2   :  { %v2183_v40 = vmax.f32 %v2142_v59, %v2182_v12  ;;  %v2116_v30 = vrot.slane %v2996_v17, 4  ;;  %v2297_v11 = vsub.s32 2, %v3458_v46  ;;  %v2301_v32 = vsub.s32 3, %v3458_v46 }
 0x1d3   :  { %v2172_v22 = vrot.slane %v2171_v34, 1  ;;  %v2193_v39 = vmax.f32 %v2191_v26, %v2192_v28  ;;  %v1848_v48 = vpop.f32.mrf.mxu0  ;;  %v2181_v2 = vmax.f32 %v2179_v36, %v2180_v18 }
 0x1d4   :  { %v2184_v20 = vrot.slane %v2183_v40, 4  ;;  %v2117_v53 = vsel %vm2093_vm10, %v2115_v9, %v2116_v30  ;;  %v2149_v56 = vadd.f32 %v2116_v30, %v2076_v24  ;;  %v2113_v57 = vrot.slane %v1848_v48, 4 }
 0x1d5   :  { %v2173_v0 = vmax.f32 %v2171_v34, %v2172_v22  ;;  %v2148_v27 = vadd.f32 %v2117_v53, %v2075_v31  ;;  %v2194_v61 = vrot.slane %v2193_v39, 2  ;;  %v2298_v47 = vrot.slane %v3167_v5, %v2297_v11 }
 0x1d6   :  { %v2185_v3 = vmax.f32 %v2183_v40, %v2184_v20  ;;  %v2206_v58 = vsel %vm2093_vm10, %v2149_v56, -inf  ;;  %v2114_v51 = vsel %vm2093_vm10, %v2112_v42, %v2113_v57  ;;  %v2147_v1 = vadd.f32 %v2113_v57, %v2074_v23 }
 0x1d7   :  { %v2278_v41 = vsel %vm2224_vm2, %v2173_v0, %v2277_v21  ;;  %v2207_v44 = vmax.f32 %v2148_v27, %v2206_v58  ;;  %v2146_v33 = vadd.f32 %v2114_v51, %v2073_v50  ;;  %v2195_v55 = vmax.f32 %v2193_v39, %v2194_v61 }
 0x1d8   :  { %v2186_v62 = vrot.slane %v2185_v3, 2  ;;  %v2198_v49 = vsel %vm2093_vm10, %v2147_v1, -inf  ;;  %v2279_v15 = vsel %vm2226_vm3, %v2181_v2, %v2278_v41  ;;  %v2302_v26 = vrot.slane %v3167_v5, %v2301_v32 }
 0x1d9   :  { %v2208_v10 = vrot.slane %v2207_v44, 4  ;;  %v2199_v37 = vmax.f32 %v2146_v33, %v2198_v49  ;;  %v2196_v29 = vrot.slane %v2195_v55, 1  ;;  %v2309_v7 = vadd.f32 %v2298_v47, %v3587_v54  ;;  %v2776_v54 = vld [vmem:[%s3821_s4] ss:$0 sm:$0xff] }
 0x1da   :  { %v2187_v19 = vmax.f32 %v2185_v3, %v2186_v62 }
 0x1db   :  { %v2209_v6 = vmax.f32 %v2207_v44, %v2208_v10  ;;  %v2200_v38 = vrot.slane %v2199_v37, 4  ;;  %v2197_v36 = vmax.f32 %v2195_v55, %v2196_v29  ;;  %v2313_v46 = vmax.f32 %v2309_v7, 0.0 }
 0x1dc   :  { %v2188_v45 = vrot.slane %v2187_v19, 1 }
 0x1dd   :  { %v2210_v63 = vrot.slane %v2209_v6, 2  ;;  %v2201_v60 = vmax.f32 %v2199_v37, %v2200_v38  ;;  %v2317_v28 = vpack.c.bf16 %v2313_v46, %v2313_v46 }
 0x1de   :  { %v2189_v14 = vmax.f32 %v2187_v19, %v2188_v45 }
 0x1df   :  { %v2211_v25 = vmax.f32 %v2209_v6, %v2210_v63  ;;  %v2202_v43 = vrot.slane %v2201_v60, 2 }
 0x1e0   :  { %v2280_v21 = vsel %vm2228_vm4, %v2189_v14, %v2279_v15 }
 0x1e1   :  { %v2203_v16 = vmax.f32 %v2201_v60, %v2202_v43  ;;  %v2212_v13 = vrot.slane %v2211_v25, 1  ;;  %v2281_v52 = vsel %vm2230_vm5, %v2197_v36, %v2280_v21 }
 0x1e3   :  { %v2204_v4 = vrot.slane %v2203_v16, 1  ;;  %v2213_v8 = vmax.f32 %v2211_v25, %v2212_v13 }
 0x1e5   :  { %v2205_v35 = vmax.f32 %v2203_v16, %v2204_v4 }
 0x1e7   :  { %v2282_v59 = vsel %vm2232_vm6, %v2205_v35, %v2281_v52 }
 0x1e8   :  { %v2283_v12 = vsel %vm2234_vm7, %v2213_v8, %v2282_v59 }
 0x1e9   :  { %v2310_v23 = vadd.f32 %v2302_v26, %v2283_v12 }
 0x1eb   :  { %v2314_v18 = vmax.f32 %v2310_v23, 0.0 }
 0x1ed   :  { %v2318_v34 = vpack.c.bf16 %v2314_v18, %v2314_v18 }
 0x1ef   :  { %2654 = vmatprep.mubr.bf16.mxu0 %v2318_v34 }
 0x1f0   :  { %2655 = vmatmul.mubr.bf16.vlgmr.msra.gmra.mxu0 %v2317_v28 }
 0x238   :  { %v2873_v17 = vpop.f32.mrf.mxu1 }
 0x23a   :  { %v2874_v24 = vpop.f32.mrf.mxu1 }
 0x23b   :  { %v2875_v40 = vadd.f32 %v2874_v24, %v2873_v17 }
 0x23c   :  { %v2876_v9 = vpop.f32.mrf.mxu1 }
 0x23d   :  { %v2617_v39 = vadd.f32 %v2875_v40, %v2776_v54 }
 0x23e   :  { %v2877_v30 = vpop.f32.mrf.mxu1 }
 0x2b0   :  { %v2895_v31 = vpop.f32.mrf.mxu0 }
 0x2b2   :  { %v2896_v22 = vpop.f32.mrf.mxu0 }
 0x2b3   :  { %v2897_v42 = vadd.f32 %v2896_v22, %v2895_v31 }
 0x2b4   :  { %v2898_v48 = vpop.f32.mrf.mxu0 }
 0x2b5   :  { %v2657_v20 = vadd.f32 %v2897_v42, %v2617_v39 }
 0x2b6   :  { %v2899_v53 = vpop.f32.mrf.mxu0 }
 0x2b7   :  { %2662 = vst [vmem:[#allocation10] sm:$0xff] %v2657_v20 }
 0x2b8   :  { %3259 = shalt.err (!%p3256_p10)
}
 0x2b9   :  { %2672 = dma.vmem_to_hbm [thread:$0]  %s2670_s16, 128, %s3822_s5, [#allocation4]  }
 0x2ba   :  { %3274 = dma.done.wait [#allocation4], 128  }
 0x2bb   :  { %3275 = vsyncadd [#allocation4], 4294967168 }
 0x2bc   :  { %2676 = vsyncpa [#allocation3], 1 }
 0x2bd   :  { %2677 = vsyncpa [#allocation6], 1 }
 0x2be   :  { %2678 = vsyncpa [#allocation9], 1 }
 0x2bf   :  { %2679 = vsyncpa [#allocation4], 1 }

</bundles_post_ra>
